<compile_context>
chip_gen: v6e
topology: v6e:2x2x1
jax: 0.10.0
libtpu: 0.0.40
codegen_flags: <defaults>
</compile_context>

<pallas_src>
import jax
import jax.numpy as jnp
from jax import lax
from jax.experimental import pallas as pl
from jax.experimental.pallas import tpu as pltpu


# ------------------------------- forward -------------------------------------
def _sentence_attention_forward(x, p):
    B, T, D = x.shape
    H = p["w_hh_f"].shape[1]
    O = p["w_out"].shape[0]
    Bp = max(8, -(-B // 8) * 8)                  # batch padded to full sublanes
    H2, H4, H6 = 2 * H, 4 * H, 6 * H
    f32 = jnp.float32
    assert O + 1 <= H6, "w_att column must fit next to w_out inside the slab"

    # ---- inputs: time-major flattened x for both directions (one slab) ----
    xp = jnp.zeros((Bp, T, D), f32).at[:B].set(x.astype(f32))
    x_fwd = jnp.transpose(xp, (1, 0, 2)).reshape(T * Bp, D)
    x_bwd = jnp.transpose(xp[:, ::-1, :], (1, 0, 2)).reshape(T * Bp, D)
    x_cat = jnp.concatenate([x_fwd, x_bwd], axis=1)          # (T*Bp, 2D)

    # ---- pack ALL weights/biases into one (rows, 6H) slab ----
    # gate column layout: [r_f r_b | z_f z_b | n_f n_b]
    def gate_cols(w_t, which):                   # (K, 3H) -> (K, 6H)
        K = w_t.shape[0]
        big = jnp.zeros((K, H6), f32)
        for g in range(3):                       # r, z, n
            c0 = (2 * g + which) * H
            big = big.at[:, c0:c0 + H].set(w_t[:, g * H:(g + 1) * H])
        return big

    def gate_bias(bf, bb):
        out = jnp.zeros((H6,), f32)
        for g in range(3):
            out = out.at[(2 * g) * H:(2 * g) * H + H].set(bf[g * H:(g + 1) * H].astype(f32))
            out = out.at[(2 * g + 1) * H:(2 * g + 1) * H + H].set(bb[g * H:(g + 1) * H].astype(f32))
        return out

    w_ih_big = jnp.concatenate(
        [gate_cols(p["w_ih_f"].T.astype(f32), 0),
         gate_cols(p["w_ih_b"].T.astype(f32), 1)], axis=0)   # (2D, 6H)
    w_hh_big = jnp.concatenate(
        [gate_cols(p["w_hh_f"].T.astype(f32), 0),
         gate_cols(p["w_hh_b"].T.astype(f32), 1)], axis=0)   # (2H, 6H) block-diag
    b_gx = gate_bias(p["b_ih_f"], p["b_ih_b"])
    b_gh = gate_bias(p["b_hh_f"], p["b_hh_b"])

    R_IH = 0
    R_HH = R_IH + 2 * D
    R_VEC = R_HH + H2
    R_OUT = -(-(R_VEC + 3) // 8) * 8
    R_BO = R_OUT + H2
    NR = -(-(R_BO + 1) // 8) * 8

    slab = jnp.zeros((NR, H6), f32)
    slab = slab.at[R_IH:R_IH + 2 * D, :].set(w_ih_big)
    slab = slab.at[R_HH:R_HH + H2, :].set(w_hh_big)
    slab = slab.at[R_VEC, :].set(b_gx)
    slab = slab.at[R_VEC + 1, :].set(b_gh)
    slab = slab.at[R_VEC + 2, 0].set(p["b_att"][0].astype(f32))
    # TODO(synk): torch.matmul(u, context_vector) with u's trailing dim == 1 is
    # only defined for context_vectors_dim == 1, so only context_vector[0] is
    # used (matches the reference semantics).
    slab = slab.at[R_VEC + 2, 1].set(p["context_vector"][0].astype(f32))
    slab = slab.at[R_OUT:R_OUT + H2, :O].set(p["w_out"].T.astype(f32))
    slab = slab.at[R_OUT:R_OUT + H2, O:O + 1].set(p["w_att"][0].astype(f32)[:, None])
    slab = slab.at[R_BO, :O].set(p["b_out"].astype(f32))

    # ------------------------------ kernel -----------------------------------
    def kernel(x_ref, w_ref, out_ref, h_ref):
        w_ih = w_ref[R_IH:R_IH + 2 * D, :]           # (2D, 6H)
        w_hh = w_ref[R_HH:R_HH + H2, :]              # (2H, 6H)
        bgx = w_ref[R_VEC:R_VEC + 1, :]              # (1, 6H)
        bgh = w_ref[R_VEC + 1:R_VEC + 2, :]          # (1, 6H)
        b_att = w_ref[R_VEC + 2:R_VEC + 3, 0:1]      # (1, 1)
        cv0 = w_ref[R_VEC + 2:R_VEC + 3, 1:2]        # (1, 1)
        w_out = w_ref[R_OUT:R_OUT + H2, 0:O]         # (2H, O)
        w_att = w_ref[R_OUT:R_OUT + H2, O:O + 1]     # (2H, 1)
        b_out = w_ref[R_BO:R_BO + 1, 0:O]            # (1, O)

        # Input projections for BOTH directions and ALL timesteps: one matmul.
        gx = jnp.dot(x_ref[...], w_ih, preferred_element_type=jnp.float32) + bgx  # (T*Bp, 6H)

        # Fused fwd/bwd recurrence, fully unrolled (T static & small).
        h = jnp.zeros((Bp, H2), jnp.float32)         # [h_fwd | h_bwd]
        for i in range(T):
            gh = jnp.dot(h, w_hh, preferred_element_type=jnp.float32) + bgh       # (Bp, 6H)
            g = gx[i * Bp:(i + 1) * Bp, :]           # fwd gates @ t=i, bwd @ t=T-1-i
            rz = jax.nn.sigmoid(g[:, 0:H4] + gh[:, 0:H4])        # [r_f r_b z_f z_b]
            r = rz[:, 0:H2]
            z = rz[:, H2:H4]
            n = jnp.tanh(g[:, H4:H6] + r * gh[:, H4:H6])         # [n_f n_b]
            h = (1.0 - z) * n + z * h
            h_ref[i * Bp:(i + 1) * Bp, 0:H] = h[:, 0:H]                  # fwd @ t=i
            h_ref[(T - 1 - i) * Bp:(T - i) * Bp, H:H2] = h[:, H:H2]      # bwd @ t=T-1-i

        # Attention scores (MXU dot), softmax over sequence, document vector.
        h_all = h_ref[...]                                               # (T*Bp, 2H)
        s_all = jnp.dot(h_all, w_att, preferred_element_type=jnp.float32)  # (T*Bp, 1)
        u_all = jnp.tanh(s_all + b_att) * cv0                            # (T*Bp, 1)

        cols = [u_all[t * Bp:(t + 1) * Bp, :] for t in range(T)]         # T x (Bp, 1)
        m = cols[0]
        for t in range(1, T):
            m = jnp.maximum(m, cols[t])
        es = [jnp.exp(c - m) for c in cols]
        den = es[0]
        for t in range(1, T):
            den = den + es[t]
        inv = pl.reciprocal(den, approx=True)                            # (Bp, 1)

        doc = (es[0] * inv) * h_all[0:Bp, :]
        for t in range(1, T):
            doc = doc + (es[t] * inv) * h_all[t * Bp:(t + 1) * Bp, :]    # (Bp, 2H)

        out_ref[...] = (jnp.dot(doc, w_out, preferred_element_type=jnp.float32)
                        + b_out)

    vmem = pl.BlockSpec(memory_space=pltpu.MemorySpace.VMEM)
    out_pad = pl.pallas_call(
        kernel,
        out_shape=jax.ShapeDtypeStruct((Bp, O), jnp.float32),
        in_specs=[vmem, vmem],
        out_specs=vmem,
        scratch_shapes=[pltpu.VMEM((T * Bp, H2), jnp.float32)],  # hidden states
    )(x_cat, slab)
    return out_pad[:B]


sentence_attention_forward = jax.jit(_sentence_attention_forward)


# -------------------------- parameters / reference ---------------------------
def make_params(key, D, H, O):
    C = H  # attention Linear(2*C, 1) applied to 2H-dim h requires C == H
    k = 1.0 / float(jnp.sqrt(jnp.float32(H)))
    keys = jax.random.split(key, 13)

    def unif(kk, shape):
        return jax.random.uniform(kk, shape, jnp.float32, -k, k)

    return dict(
        w_ih_f=unif(keys[0], (3 * H, D)), w_hh_f=unif(keys[1], (3 * H, H)),
        b_ih_f=unif(keys[2], (3 * H,)),   b_hh_f=unif(keys[3], (3 * H,)),
        w_ih_b=unif(keys[4], (3 * H, D)), w_hh_b=unif(keys[5], (3 * H, H)),
        b_ih_b=unif(keys[6], (3 * H,)),   b_hh_b=unif(keys[7], (3 * H,)),
        w_att=unif(keys[8], (1, 2 * C)),  b_att=unif(keys[9], (1,)),
        context_vector=jax.random.normal(keys[10], (C,), jnp.float32),
        w_out=unif(keys[11], (O, 2 * C)), b_out=unif(keys[12], (O,)),
    )


def _gru_dir_ref(x, wih, whh, bih, bhh, reverse):
    B, T, D = x.shape
    H = whh.shape[1]
    xs = jnp.flip(x, axis=1) if reverse else x

    def step(h, xt):
        gx = xt @ wih.T + bih
        gh = h @ whh.T + bhh
        r = jax.nn.sigmoid(gx[:, :H] + gh[:, :H])
        z = jax.nn.sigmoid(gx[:, H:2 * H] + gh[:, H:2 * H])
        n = jnp.tanh(gx[:, 2 * H:] + r * gh[:, 2 * H:])
        h_new = (1.0 - z) * n + z * h
        return h_new, h_new

    _, hs = lax.scan(step, jnp.zeros((B, H), jnp.float32), jnp.swapaxes(xs, 0, 1))
    hs = jnp.swapaxes(hs, 0, 1)
    return jnp.flip(hs, axis=1) if reverse else hs


def reference_forward(x, p):
    hf = _gru_dir_ref(x, p["w_ih_f"], p["w_hh_f"], p["b_ih_f"], p["b_hh_f"], False)
    hb = _gru_dir_ref(x, p["w_ih_b"], p["w_hh_b"], p["b_ih_b"], p["b_hh_b"], True)
    h = jnp.concatenate([hf, hb], axis=-1)                     # (B, T, 2H)
    u = jnp.tanh(h @ p["w_att"].T + p["b_att"])                # (B, T, 1)
    scores = u[..., 0] * p["context_vector"][0]                # (B, T)
    w = jax.nn.softmax(scores, axis=1)
    doc = jnp.sum(w[:, :, None] * h, axis=1)                   # (B, 2H)
    return doc @ p["w_out"].T + p["b_out"]


# ---------------------------------- main -------------------------------------
if __name__ == "__main__":
    B, T, D_in, H, O = 2, 8, 16, 16, 8   # batch, seq, gru_input, gru_hidden(=C), gru_output
    key = jax.random.PRNGKey(0)
    kx, kp = jax.random.split(key)
    x = jax.random.normal(kx, (B, T, D_in), jnp.float32)   # sentence_embedding
    params = make_params(kp, D_in, H, O)

    out = jax.block_until_ready(sentence_attention_forward(x, params))
    ref = jax.block_until_ready(reference_forward(x, params))

    assert out.shape == (B, O)
    assert bool(jnp.all(jnp.isfinite(out)))
    assert bool(jnp.allclose(out, ref, atol=5e-2, rtol=5e-2)), (out, ref)
    print("KERNEL_OK")
</pallas_src>

<mosaic_0001>
module attributes {stable_mosaic.version = 11 : i64} {
  func.func @kernel(%arg0: memref<64x32xf32, #tpu.memory_space<vmem>>, %arg1: memref<112x96xf32, #tpu.memory_space<vmem>>, %arg2: memref<8x8xf32, #tpu.memory_space<vmem>>, %arg3: memref<64x32xf32, #tpu.memory_space<vmem>>) attributes {dimension_semantics = [], scalar_prefetch = 0 : i64, scratch_operands = 1 : i64, tpu.core_type = #tpu.core_type<tc>} {
    %c0 = arith.constant 0 : index
    %c0_0 = arith.constant 0 : index
    %0 = vector.load %arg1[%c0, %c0_0] : memref<112x96xf32, #tpu.memory_space<vmem>>, vector<32x96xf32>
    %c32 = arith.constant 32 : index
    %c0_1 = arith.constant 0 : index
    %1 = vector.load %arg1[%c32, %c0_1] : memref<112x96xf32, #tpu.memory_space<vmem>>, vector<32x96xf32>
    %c64 = arith.constant 64 : index
    %c0_2 = arith.constant 0 : index
    %2 = vector.load %arg1[%c64, %c0_2] : memref<112x96xf32, #tpu.memory_space<vmem>>, vector<1x96xf32>
    %c65 = arith.constant 65 : index
    %c0_3 = arith.constant 0 : index
    %3 = vector.load %arg1[%c65, %c0_3] : memref<112x96xf32, #tpu.memory_space<vmem>>, vector<1x96xf32>
    %c66 = arith.constant 66 : index
    %c0_4 = arith.constant 0 : index
    %4 = vector.load %arg1[%c66, %c0_4] : memref<112x96xf32, #tpu.memory_space<vmem>>, vector<1x1xf32>
    %c66_5 = arith.constant 66 : index
    %c1 = arith.constant 1 : index
    %5 = vector.load %arg1[%c66_5, %c1] : memref<112x96xf32, #tpu.memory_space<vmem>>, vector<1x1xf32>
    %c72 = arith.constant 72 : index
    %c0_6 = arith.constant 0 : index
    %6 = vector.load %arg1[%c72, %c0_6] : memref<112x96xf32, #tpu.memory_space<vmem>>, vector<32x8xf32>
    %c72_7 = arith.constant 72 : index
    %c8 = arith.constant 8 : index
    %7 = vector.load %arg1[%c72_7, %c8] : memref<112x96xf32, #tpu.memory_space<vmem>>, vector<32x1xf32>
    %c104 = arith.constant 104 : index
    %c0_8 = arith.constant 0 : index
    %8 = vector.load %arg1[%c104, %c0_8] : memref<112x96xf32, #tpu.memory_space<vmem>>, vector<1x8xf32>
    %c0_9 = arith.constant 0 : index
    %c0_10 = arith.constant 0 : index
    %9 = vector.load %arg0[%c0_9, %c0_10] : memref<64x32xf32, #tpu.memory_space<vmem>>, vector<64x32xf32>
    %cst = arith.constant dense<0.000000e+00> : vector<64x96xf32>
    %10 = tpu.matmul %9, %0, %cst {dimension_numbers = #tpu.dot_dimension_numbers<[1], [0], [0], [1], [0, 0, 1, 1], [], []>} : vector<64x32xf32>, vector<32x96xf32>, vector<64x96xf32> -> vector<64x96xf32>
    %11 = vector.broadcast %2 : vector<1x96xf32> to vector<64x96xf32>
    %12 = arith.addf %10, %11 : vector<64x96xf32>
    %cst_11 = arith.constant 0.000000e+00 : f32
    %13 = vector.broadcast %cst_11 : f32 to vector<8x32xf32>
    %cst_12 = arith.constant dense<0.000000e+00> : vector<8x96xf32>
    %14 = tpu.matmul %13, %1, %cst_12 {dimension_numbers = #tpu.dot_dimension_numbers<[1], [0], [0], [1], [0, 0, 1, 1], [], []>} : vector<8x32xf32>, vector<32x96xf32>, vector<8x96xf32> -> vector<8x96xf32>
    %15 = vector.broadcast %3 : vector<1x96xf32> to vector<8x96xf32>
    %16 = arith.addf %14, %15 : vector<8x96xf32>
    %17 = vector.extract_strided_slice %12 {offsets = [0, 0], sizes = [8, 96], strides = [1, 1]} : vector<64x96xf32> to vector<8x96xf32>
    %18 = vector.extract_strided_slice %17 {offsets = [0, 0], sizes = [8, 64], strides = [1, 1]} : vector<8x96xf32> to vector<8x64xf32>
    %19 = vector.extract_strided_slice %16 {offsets = [0, 0], sizes = [8, 64], strides = [1, 1]} : vector<8x96xf32> to vector<8x64xf32>
    %20 = arith.addf %18, %19 : vector<8x64xf32>
    %21 = arith.negf %20 : vector<8x64xf32>
    %22 = math.exp %21 : vector<8x64xf32>
    %cst_13 = arith.constant 1.000000e+00 : f32
    %23 = vector.broadcast %cst_13 : f32 to vector<8x64xf32>
    %24 = arith.addf %23, %22 : vector<8x64xf32>
    %25 = arith.divf %23, %24 : vector<8x64xf32>
    %26 = vector.extract_strided_slice %25 {offsets = [0, 0], sizes = [8, 32], strides = [1, 1]} : vector<8x64xf32> to vector<8x32xf32>
    %27 = vector.extract_strided_slice %25 {offsets = [0, 32], sizes = [8, 32], strides = [1, 1]} : vector<8x64xf32> to vector<8x32xf32>
    %28 = vector.extract_strided_slice %17 {offsets = [0, 64], sizes = [8, 32], strides = [1, 1]} : vector<8x96xf32> to vector<8x32xf32>
    %29 = vector.extract_strided_slice %16 {offsets = [0, 64], sizes = [8, 32], strides = [1, 1]} : vector<8x96xf32> to vector<8x32xf32>
    %30 = arith.mulf %26, %29 : vector<8x32xf32>
    %31 = arith.addf %28, %30 : vector<8x32xf32>
    %32 = math.tanh %31 : vector<8x32xf32>
    %cst_14 = arith.constant 1.000000e+00 : f32
    %33 = vector.broadcast %cst_14 : f32 to vector<8x32xf32>
    %34 = arith.subf %33, %27 : vector<8x32xf32>
    %35 = arith.mulf %34, %32 : vector<8x32xf32>
    %36 = arith.mulf %27, %13 : vector<8x32xf32>
    %37 = arith.addf %35, %36 : vector<8x32xf32>
    %38 = vector.extract_strided_slice %37 {offsets = [0, 0], sizes = [8, 16], strides = [1, 1]} : vector<8x32xf32> to vector<8x16xf32>
    %c0_15 = arith.constant 0 : index
    %c0_16 = arith.constant 0 : index
    %39 = vector.load %arg3[%c0_15, %c0_16] : memref<64x32xf32, #tpu.memory_space<vmem>>, vector<8x16xf32>
    tpu.vector_store %arg3[%c0_15, %c0_16], %38 {strides = array<i32>} : memref<64x32xf32, #tpu.memory_space<vmem>>, vector<8x16xf32>,
    %40 = vector.extract_strided_slice %37 {offsets = [0, 16], sizes = [8, 16], strides = [1, 1]} : vector<8x32xf32> to vector<8x16xf32>
    %c56 = arith.constant 56 : index
    %c16 = arith.constant 16 : index
    %41 = vector.load %arg3[%c56, %c16] : memref<64x32xf32, #tpu.memory_space<vmem>>, vector<8x16xf32>
    tpu.vector_store %arg3[%c56, %c16], %40 {strides = array<i32>} : memref<64x32xf32, #tpu.memory_space<vmem>>, vector<8x16xf32>,
    %cst_17 = arith.constant dense<0.000000e+00> : vector<8x96xf32>
    %42 = tpu.matmul %37, %1, %cst_17 {dimension_numbers = #tpu.dot_dimension_numbers<[1], [0], [0], [1], [0, 0, 1, 1], [], []>} : vector<8x32xf32>, vector<32x96xf32>, vector<8x96xf32> -> vector<8x96xf32>
    %43 = vector.broadcast %3 : vector<1x96xf32> to vector<8x96xf32>
    %44 = arith.addf %42, %43 : vector<8x96xf32>
    %45 = vector.extract_strided_slice %12 {offsets = [8, 0], sizes = [8, 96], strides = [1, 1]} : vector<64x96xf32> to vector<8x96xf32>
    %46 = vector.extract_strided_slice %45 {offsets = [0, 0], sizes = [8, 64], strides = [1, 1]} : vector<8x96xf32> to vector<8x64xf32>
    %47 = vector.extract_strided_slice %44 {offsets = [0, 0], sizes = [8, 64], strides = [1, 1]} : vector<8x96xf32> to vector<8x64xf32>
    %48 = arith.addf %46, %47 : vector<8x64xf32>
    %49 = arith.negf %48 : vector<8x64xf32>
    %50 = math.exp %49 : vector<8x64xf32>
    %cst_18 = arith.constant 1.000000e+00 : f32
    %51 = vector.broadcast %cst_18 : f32 to vector<8x64xf32>
    %52 = arith.addf %51, %50 : vector<8x64xf32>
    %53 = arith.divf %51, %52 : vector<8x64xf32>
    %54 = vector.extract_strided_slice %53 {offsets = [0, 0], sizes = [8, 32], strides = [1, 1]} : vector<8x64xf32> to vector<8x32xf32>
    %55 = vector.extract_strided_slice %53 {offsets = [0, 32], sizes = [8, 32], strides = [1, 1]} : vector<8x64xf32> to vector<8x32xf32>
    %56 = vector.extract_strided_slice %45 {offsets = [0, 64], sizes = [8, 32], strides = [1, 1]} : vector<8x96xf32> to vector<8x32xf32>
    %57 = vector.extract_strided_slice %44 {offsets = [0, 64], sizes = [8, 32], strides = [1, 1]} : vector<8x96xf32> to vector<8x32xf32>
    %58 = arith.mulf %54, %57 : vector<8x32xf32>
    %59 = arith.addf %56, %58 : vector<8x32xf32>
    %60 = math.tanh %59 : vector<8x32xf32>
    %cst_19 = arith.constant 1.000000e+00 : f32
    %61 = vector.broadcast %cst_19 : f32 to vector<8x32xf32>
    %62 = arith.subf %61, %55 : vector<8x32xf32>
    %63 = arith.mulf %62, %60 : vector<8x32xf32>
    %64 = arith.mulf %55, %37 : vector<8x32xf32>
    %65 = arith.addf %63, %64 : vector<8x32xf32>
    %66 = vector.extract_strided_slice %65 {offsets = [0, 0], sizes = [8, 16], strides = [1, 1]} : vector<8x32xf32> to vector<8x16xf32>
    %c8_20 = arith.constant 8 : index
    %c0_21 = arith.constant 0 : index
    %67 = vector.load %arg3[%c8_20, %c0_21] : memref<64x32xf32, #tpu.memory_space<vmem>>, vector<8x16xf32>
    tpu.vector_store %arg3[%c8_20, %c0_21], %66 {strides = array<i32>} : memref<64x32xf32, #tpu.memory_space<vmem>>, vector<8x16xf32>,
    %68 = vector.extract_strided_slice %65 {offsets = [0, 16], sizes = [8, 16], strides = [1, 1]} : vector<8x32xf32> to vector<8x16xf32>
    %c48 = arith.constant 48 : index
    %c16_22 = arith.constant 16 : index
    %69 = vector.load %arg3[%c48, %c16_22] : memref<64x32xf32, #tpu.memory_space<vmem>>, vector<8x16xf32>
    tpu.vector_store %arg3[%c48, %c16_22], %68 {strides = array<i32>} : memref<64x32xf32, #tpu.memory_space<vmem>>, vector<8x16xf32>,
    %cst_23 = arith.constant dense<0.000000e+00> : vector<8x96xf32>
    %70 = tpu.matmul %65, %1, %cst_23 {dimension_numbers = #tpu.dot_dimension_numbers<[1], [0], [0], [1], [0, 0, 1, 1], [], []>} : vector<8x32xf32>, vector<32x96xf32>, vector<8x96xf32> -> vector<8x96xf32>
    %71 = vector.broadcast %3 : vector<1x96xf32> to vector<8x96xf32>
    %72 = arith.addf %70, %71 : vector<8x96xf32>
    %73 = vector.extract_strided_slice %12 {offsets = [16, 0], sizes = [8, 96], strides = [1, 1]} : vector<64x96xf32> to vector<8x96xf32>
    %74 = vector.extract_strided_slice %73 {offsets = [0, 0], sizes = [8, 64], strides = [1, 1]} : vector<8x96xf32> to vector<8x64xf32>
    %75 = vector.extract_strided_slice %72 {offsets = [0, 0], sizes = [8, 64], strides = [1, 1]} : vector<8x96xf32> to vector<8x64xf32>
    %76 = arith.addf %74, %75 : vector<8x64xf32>
    %77 = arith.negf %76 : vector<8x64xf32>
    %78 = math.exp %77 : vector<8x64xf32>
    %cst_24 = arith.constant 1.000000e+00 : f32
    %79 = vector.broadcast %cst_24 : f32 to vector<8x64xf32>
    %80 = arith.addf %79, %78 : vector<8x64xf32>
    %81 = arith.divf %79, %80 : vector<8x64xf32>
    %82 = vector.extract_strided_slice %81 {offsets = [0, 0], sizes = [8, 32], strides = [1, 1]} : vector<8x64xf32> to vector<8x32xf32>
    %83 = vector.extract_strided_slice %81 {offsets = [0, 32], sizes = [8, 32], strides = [1, 1]} : vector<8x64xf32> to vector<8x32xf32>
    %84 = vector.extract_strided_slice %73 {offsets = [0, 64], sizes = [8, 32], strides = [1, 1]} : vector<8x96xf32> to vector<8x32xf32>
    %85 = vector.extract_strided_slice %72 {offsets = [0, 64], sizes = [8, 32], strides = [1, 1]} : vector<8x96xf32> to vector<8x32xf32>
    %86 = arith.mulf %82, %85 : vector<8x32xf32>
    %87 = arith.addf %84, %86 : vector<8x32xf32>
    %88 = math.tanh %87 : vector<8x32xf32>
    %cst_25 = arith.constant 1.000000e+00 : f32
    %89 = vector.broadcast %cst_25 : f32 to vector<8x32xf32>
    %90 = arith.subf %89, %83 : vector<8x32xf32>
    %91 = arith.mulf %90, %88 : vector<8x32xf32>
    %92 = arith.mulf %83, %65 : vector<8x32xf32>
    %93 = arith.addf %91, %92 : vector<8x32xf32>
    %94 = vector.extract_strided_slice %93 {offsets = [0, 0], sizes = [8, 16], strides = [1, 1]} : vector<8x32xf32> to vector<8x16xf32>
    %c16_26 = arith.constant 16 : index
    %c0_27 = arith.constant 0 : index
    %95 = vector.load %arg3[%c16_26, %c0_27] : memref<64x32xf32, #tpu.memory_space<vmem>>, vector<8x16xf32>
    tpu.vector_store %arg3[%c16_26, %c0_27], %94 {strides = array<i32>} : memref<64x32xf32, #tpu.memory_space<vmem>>, vector<8x16xf32>,
    %96 = vector.extract_strided_slice %93 {offsets = [0, 16], sizes = [8, 16], strides = [1, 1]} : vector<8x32xf32> to vector<8x16xf32>
    %c40 = arith.constant 40 : index
    %c16_28 = arith.constant 16 : index
    %97 = vector.load %arg3[%c40, %c16_28] : memref<64x32xf32, #tpu.memory_space<vmem>>, vector<8x16xf32>
    tpu.vector_store %arg3[%c40, %c16_28], %96 {strides = array<i32>} : memref<64x32xf32, #tpu.memory_space<vmem>>, vector<8x16xf32>,
    %cst_29 = arith.constant dense<0.000000e+00> : vector<8x96xf32>
    %98 = tpu.matmul %93, %1, %cst_29 {dimension_numbers = #tpu.dot_dimension_numbers<[1], [0], [0], [1], [0, 0, 1, 1], [], []>} : vector<8x32xf32>, vector<32x96xf32>, vector<8x96xf32> -> vector<8x96xf32>
    %99 = vector.broadcast %3 : vector<1x96xf32> to vector<8x96xf32>
    %100 = arith.addf %98, %99 : vector<8x96xf32>
    %101 = vector.extract_strided_slice %12 {offsets = [24, 0], sizes = [8, 96], strides = [1, 1]} : vector<64x96xf32> to vector<8x96xf32>
    %102 = vector.extract_strided_slice %101 {offsets = [0, 0], sizes = [8, 64], strides = [1, 1]} : vector<8x96xf32> to vector<8x64xf32>
    %103 = vector.extract_strided_slice %100 {offsets = [0, 0], sizes = [8, 64], strides = [1, 1]} : vector<8x96xf32> to vector<8x64xf32>
    %104 = arith.addf %102, %103 : vector<8x64xf32>
    %105 = arith.negf %104 : vector<8x64xf32>
    %106 = math.exp %105 : vector<8x64xf32>
    %cst_30 = arith.constant 1.000000e+00 : f32
    %107 = vector.broadcast %cst_30 : f32 to vector<8x64xf32>
    %108 = arith.addf %107, %106 : vector<8x64xf32>
    %109 = arith.divf %107, %108 : vector<8x64xf32>
    %110 = vector.extract_strided_slice %109 {offsets = [0, 0], sizes = [8, 32], strides = [1, 1]} : vector<8x64xf32> to vector<8x32xf32>
    %111 = vector.extract_strided_slice %109 {offsets = [0, 32], sizes = [8, 32], strides = [1, 1]} : vector<8x64xf32> to vector<8x32xf32>
    %112 = vector.extract_strided_slice %101 {offsets = [0, 64], sizes = [8, 32], strides = [1, 1]} : vector<8x96xf32> to vector<8x32xf32>
    %113 = vector.extract_strided_slice %100 {offsets = [0, 64], sizes = [8, 32], strides = [1, 1]} : vector<8x96xf32> to vector<8x32xf32>
    %114 = arith.mulf %110, %113 : vector<8x32xf32>
    %115 = arith.addf %112, %114 : vector<8x32xf32>
    %116 = math.tanh %115 : vector<8x32xf32>
    %cst_31 = arith.constant 1.000000e+00 : f32
    %117 = vector.broadcast %cst_31 : f32 to vector<8x32xf32>
    %118 = arith.subf %117, %111 : vector<8x32xf32>
    %119 = arith.mulf %118, %116 : vector<8x32xf32>
    %120 = arith.mulf %111, %93 : vector<8x32xf32>
    %121 = arith.addf %119, %120 : vector<8x32xf32>
    %122 = vector.extract_strided_slice %121 {offsets = [0, 0], sizes = [8, 16], strides = [1, 1]} : vector<8x32xf32> to vector<8x16xf32>
    %c24 = arith.constant 24 : index
    %c0_32 = arith.constant 0 : index
    %123 = vector.load %arg3[%c24, %c0_32] : memref<64x32xf32, #tpu.memory_space<vmem>>, vector<8x16xf32>
    tpu.vector_store %arg3[%c24, %c0_32], %122 {strides = array<i32>} : memref<64x32xf32, #tpu.memory_space<vmem>>, vector<8x16xf32>,
    %124 = vector.extract_strided_slice %121 {offsets = [0, 16], sizes = [8, 16], strides = [1, 1]} : vector<8x32xf32> to vector<8x16xf32>
    %c32_33 = arith.constant 32 : index
    %c16_34 = arith.constant 16 : index
    %125 = vector.load %arg3[%c32_33, %c16_34] : memref<64x32xf32, #tpu.memory_space<vmem>>, vector<8x16xf32>
    tpu.vector_store %arg3[%c32_33, %c16_34], %124 {strides = array<i32>} : memref<64x32xf32, #tpu.memory_space<vmem>>, vector<8x16xf32>,
    %cst_35 = arith.constant dense<0.000000e+00> : vector<8x96xf32>
    %126 = tpu.matmul %121, %1, %cst_35 {dimension_numbers = #tpu.dot_dimension_numbers<[1], [0], [0], [1], [0, 0, 1, 1], [], []>} : vector<8x32xf32>, vector<32x96xf32>, vector<8x96xf32> -> vector<8x96xf32>
    %127 = vector.broadcast %3 : vector<1x96xf32> to vector<8x96xf32>
    %128 = arith.addf %126, %127 : vector<8x96xf32>
    %129 = vector.extract_strided_slice %12 {offsets = [32, 0], sizes = [8, 96], strides = [1, 1]} : vector<64x96xf32> to vector<8x96xf32>
    %130 = vector.extract_strided_slice %129 {offsets = [0, 0], sizes = [8, 64], strides = [1, 1]} : vector<8x96xf32> to vector<8x64xf32>
    %131 = vector.extract_strided_slice %128 {offsets = [0, 0], sizes = [8, 64], strides = [1, 1]} : vector<8x96xf32> to vector<8x64xf32>
    %132 = arith.addf %130, %131 : vector<8x64xf32>
    %133 = arith.negf %132 : vector<8x64xf32>
    %134 = math.exp %133 : vector<8x64xf32>
    %cst_36 = arith.constant 1.000000e+00 : f32
    %135 = vector.broadcast %cst_36 : f32 to vector<8x64xf32>
    %136 = arith.addf %135, %134 : vector<8x64xf32>
    %137 = arith.divf %135, %136 : vector<8x64xf32>
    %138 = vector.extract_strided_slice %137 {offsets = [0, 0], sizes = [8, 32], strides = [1, 1]} : vector<8x64xf32> to vector<8x32xf32>
    %139 = vector.extract_strided_slice %137 {offsets = [0, 32], sizes = [8, 32], strides = [1, 1]} : vector<8x64xf32> to vector<8x32xf32>
    %140 = vector.extract_strided_slice %129 {offsets = [0, 64], sizes = [8, 32], strides = [1, 1]} : vector<8x96xf32> to vector<8x32xf32>
    %141 = vector.extract_strided_slice %128 {offsets = [0, 64], sizes = [8, 32], strides = [1, 1]} : vector<8x96xf32> to vector<8x32xf32>
    %142 = arith.mulf %138, %141 : vector<8x32xf32>
    %143 = arith.addf %140, %142 : vector<8x32xf32>
    %144 = math.tanh %143 : vector<8x32xf32>
    %cst_37 = arith.constant 1.000000e+00 : f32
    %145 = vector.broadcast %cst_37 : f32 to vector<8x32xf32>
    %146 = arith.subf %145, %139 : vector<8x32xf32>
    %147 = arith.mulf %146, %144 : vector<8x32xf32>
    %148 = arith.mulf %139, %121 : vector<8x32xf32>
    %149 = arith.addf %147, %148 : vector<8x32xf32>
    %150 = vector.extract_strided_slice %149 {offsets = [0, 0], sizes = [8, 16], strides = [1, 1]} : vector<8x32xf32> to vector<8x16xf32>
    %c32_38 = arith.constant 32 : index
    %c0_39 = arith.constant 0 : index
    %151 = vector.load %arg3[%c32_38, %c0_39] : memref<64x32xf32, #tpu.memory_space<vmem>>, vector<8x16xf32>
    tpu.vector_store %arg3[%c32_38, %c0_39], %150 {strides = array<i32>} : memref<64x32xf32, #tpu.memory_space<vmem>>, vector<8x16xf32>,
    %152 = vector.extract_strided_slice %149 {offsets = [0, 16], sizes = [8, 16], strides = [1, 1]} : vector<8x32xf32> to vector<8x16xf32>
    %c24_40 = arith.constant 24 : index
    %c16_41 = arith.constant 16 : index
    %153 = vector.load %arg3[%c24_40, %c16_41] : memref<64x32xf32, #tpu.memory_space<vmem>>, vector<8x16xf32>
    tpu.vector_store %arg3[%c24_40, %c16_41], %152 {strides = array<i32>} : memref<64x32xf32, #tpu.memory_space<vmem>>, vector<8x16xf32>,
    %cst_42 = arith.constant dense<0.000000e+00> : vector<8x96xf32>
    %154 = tpu.matmul %149, %1, %cst_42 {dimension_numbers = #tpu.dot_dimension_numbers<[1], [0], [0], [1], [0, 0, 1, 1], [], []>} : vector<8x32xf32>, vector<32x96xf32>, vector<8x96xf32> -> vector<8x96xf32>
    %155 = vector.broadcast %3 : vector<1x96xf32> to vector<8x96xf32>
    %156 = arith.addf %154, %155 : vector<8x96xf32>
    %157 = vector.extract_strided_slice %12 {offsets = [40, 0], sizes = [8, 96], strides = [1, 1]} : vector<64x96xf32> to vector<8x96xf32>
    %158 = vector.extract_strided_slice %157 {offsets = [0, 0], sizes = [8, 64], strides = [1, 1]} : vector<8x96xf32> to vector<8x64xf32>
    %159 = vector.extract_strided_slice %156 {offsets = [0, 0], sizes = [8, 64], strides = [1, 1]} : vector<8x96xf32> to vector<8x64xf32>
    %160 = arith.addf %158, %159 : vector<8x64xf32>
    %161 = arith.negf %160 : vector<8x64xf32>
    %162 = math.exp %161 : vector<8x64xf32>
    %cst_43 = arith.constant 1.000000e+00 : f32
    %163 = vector.broadcast %cst_43 : f32 to vector<8x64xf32>
    %164 = arith.addf %163, %162 : vector<8x64xf32>
    %165 = arith.divf %163, %164 : vector<8x64xf32>
    %166 = vector.extract_strided_slice %165 {offsets = [0, 0], sizes = [8, 32], strides = [1, 1]} : vector<8x64xf32> to vector<8x32xf32>
    %167 = vector.extract_strided_slice %165 {offsets = [0, 32], sizes = [8, 32], strides = [1, 1]} : vector<8x64xf32> to vector<8x32xf32>
    %168 = vector.extract_strided_slice %157 {offsets = [0, 64], sizes = [8, 32], strides = [1, 1]} : vector<8x96xf32> to vector<8x32xf32>
    %169 = vector.extract_strided_slice %156 {offsets = [0, 64], sizes = [8, 32], strides = [1, 1]} : vector<8x96xf32> to vector<8x32xf32>
    %170 = arith.mulf %166, %169 : vector<8x32xf32>
    %171 = arith.addf %168, %170 : vector<8x32xf32>
    %172 = math.tanh %171 : vector<8x32xf32>
    %cst_44 = arith.constant 1.000000e+00 : f32
    %173 = vector.broadcast %cst_44 : f32 to vector<8x32xf32>
    %174 = arith.subf %173, %167 : vector<8x32xf32>
    %175 = arith.mulf %174, %172 : vector<8x32xf32>
    %176 = arith.mulf %167, %149 : vector<8x32xf32>
    %177 = arith.addf %175, %176 : vector<8x32xf32>
    %178 = vector.extract_strided_slice %177 {offsets = [0, 0], sizes = [8, 16], strides = [1, 1]} : vector<8x32xf32> to vector<8x16xf32>
    %c40_45 = arith.constant 40 : index
    %c0_46 = arith.constant 0 : index
    %179 = vector.load %arg3[%c40_45, %c0_46] : memref<64x32xf32, #tpu.memory_space<vmem>>, vector<8x16xf32>
    tpu.vector_store %arg3[%c40_45, %c0_46], %178 {strides = array<i32>} : memref<64x32xf32, #tpu.memory_space<vmem>>, vector<8x16xf32>,
    %180 = vector.extract_strided_slice %177 {offsets = [0, 16], sizes = [8, 16], strides = [1, 1]} : vector<8x32xf32> to vector<8x16xf32>
    %c16_47 = arith.constant 16 : index
    %c16_48 = arith.constant 16 : index
    %181 = vector.load %arg3[%c16_47, %c16_48] : memref<64x32xf32, #tpu.memory_space<vmem>>, vector<8x16xf32>
    tpu.vector_store %arg3[%c16_47, %c16_48], %180 {strides = array<i32>} : memref<64x32xf32, #tpu.memory_space<vmem>>, vector<8x16xf32>,
    %cst_49 = arith.constant dense<0.000000e+00> : vector<8x96xf32>
    %182 = tpu.matmul %177, %1, %cst_49 {dimension_numbers = #tpu.dot_dimension_numbers<[1], [0], [0], [1], [0, 0, 1, 1], [], []>} : vector<8x32xf32>, vector<32x96xf32>, vector<8x96xf32> -> vector<8x96xf32>
    %183 = vector.broadcast %3 : vector<1x96xf32> to vector<8x96xf32>
    %184 = arith.addf %182, %183 : vector<8x96xf32>
    %185 = vector.extract_strided_slice %12 {offsets = [48, 0], sizes = [8, 96], strides = [1, 1]} : vector<64x96xf32> to vector<8x96xf32>
    %186 = vector.extract_strided_slice %185 {offsets = [0, 0], sizes = [8, 64], strides = [1, 1]} : vector<8x96xf32> to vector<8x64xf32>
    %187 = vector.extract_strided_slice %184 {offsets = [0, 0], sizes = [8, 64], strides = [1, 1]} : vector<8x96xf32> to vector<8x64xf32>
    %188 = arith.addf %186, %187 : vector<8x64xf32>
    %189 = arith.negf %188 : vector<8x64xf32>
    %190 = math.exp %189 : vector<8x64xf32>
    %cst_50 = arith.constant 1.000000e+00 : f32
    %191 = vector.broadcast %cst_50 : f32 to vector<8x64xf32>
    %192 = arith.addf %191, %190 : vector<8x64xf32>
    %193 = arith.divf %191, %192 : vector<8x64xf32>
    %194 = vector.extract_strided_slice %193 {offsets = [0, 0], sizes = [8, 32], strides = [1, 1]} : vector<8x64xf32> to vector<8x32xf32>
    %195 = vector.extract_strided_slice %193 {offsets = [0, 32], sizes = [8, 32], strides = [1, 1]} : vector<8x64xf32> to vector<8x32xf32>
    %196 = vector.extract_strided_slice %185 {offsets = [0, 64], sizes = [8, 32], strides = [1, 1]} : vector<8x96xf32> to vector<8x32xf32>
    %197 = vector.extract_strided_slice %184 {offsets = [0, 64], sizes = [8, 32], strides = [1, 1]} : vector<8x96xf32> to vector<8x32xf32>
    %198 = arith.mulf %194, %197 : vector<8x32xf32>
    %199 = arith.addf %196, %198 : vector<8x32xf32>
    %200 = math.tanh %199 : vector<8x32xf32>
    %cst_51 = arith.constant 1.000000e+00 : f32
    %201 = vector.broadcast %cst_51 : f32 to vector<8x32xf32>
    %202 = arith.subf %201, %195 : vector<8x32xf32>
    %203 = arith.mulf %202, %200 : vector<8x32xf32>
    %204 = arith.mulf %195, %177 : vector<8x32xf32>
    %205 = arith.addf %203, %204 : vector<8x32xf32>
    %206 = vector.extract_strided_slice %205 {offsets = [0, 0], sizes = [8, 16], strides = [1, 1]} : vector<8x32xf32> to vector<8x16xf32>
    %c48_52 = arith.constant 48 : index
    %c0_53 = arith.constant 0 : index
    %207 = vector.load %arg3[%c48_52, %c0_53] : memref<64x32xf32, #tpu.memory_space<vmem>>, vector<8x16xf32>
    tpu.vector_store %arg3[%c48_52, %c0_53], %206 {strides = array<i32>} : memref<64x32xf32, #tpu.memory_space<vmem>>, vector<8x16xf32>,
    %208 = vector.extract_strided_slice %205 {offsets = [0, 16], sizes = [8, 16], strides = [1, 1]} : vector<8x32xf32> to vector<8x16xf32>
    %c8_54 = arith.constant 8 : index
    %c16_55 = arith.constant 16 : index
    %209 = vector.load %arg3[%c8_54, %c16_55] : memref<64x32xf32, #tpu.memory_space<vmem>>, vector<8x16xf32>
    tpu.vector_store %arg3[%c8_54, %c16_55], %208 {strides = array<i32>} : memref<64x32xf32, #tpu.memory_space<vmem>>, vector<8x16xf32>,
    %cst_56 = arith.constant dense<0.000000e+00> : vector<8x96xf32>
    %210 = tpu.matmul %205, %1, %cst_56 {dimension_numbers = #tpu.dot_dimension_numbers<[1], [0], [0], [1], [0, 0, 1, 1], [], []>} : vector<8x32xf32>, vector<32x96xf32>, vector<8x96xf32> -> vector<8x96xf32>
    %211 = vector.broadcast %3 : vector<1x96xf32> to vector<8x96xf32>
    %212 = arith.addf %210, %211 : vector<8x96xf32>
    %213 = vector.extract_strided_slice %12 {offsets = [56, 0], sizes = [8, 96], strides = [1, 1]} : vector<64x96xf32> to vector<8x96xf32>
    %214 = vector.extract_strided_slice %213 {offsets = [0, 0], sizes = [8, 64], strides = [1, 1]} : vector<8x96xf32> to vector<8x64xf32>
    %215 = vector.extract_strided_slice %212 {offsets = [0, 0], sizes = [8, 64], strides = [1, 1]} : vector<8x96xf32> to vector<8x64xf32>
    %216 = arith.addf %214, %215 : vector<8x64xf32>
    %217 = arith.negf %216 : vector<8x64xf32>
    %218 = math.exp %217 : vector<8x64xf32>
    %cst_57 = arith.constant 1.000000e+00 : f32
    %219 = vector.broadcast %cst_57 : f32 to vector<8x64xf32>
    %220 = arith.addf %219, %218 : vector<8x64xf32>
    %221 = arith.divf %219, %220 : vector<8x64xf32>
    %222 = vector.extract_strided_slice %221 {offsets = [0, 0], sizes = [8, 32], strides = [1, 1]} : vector<8x64xf32> to vector<8x32xf32>
    %223 = vector.extract_strided_slice %221 {offsets = [0, 32], sizes = [8, 32], strides = [1, 1]} : vector<8x64xf32> to vector<8x32xf32>
    %224 = vector.extract_strided_slice %213 {offsets = [0, 64], sizes = [8, 32], strides = [1, 1]} : vector<8x96xf32> to vector<8x32xf32>
    %225 = vector.extract_strided_slice %212 {offsets = [0, 64], sizes = [8, 32], strides = [1, 1]} : vector<8x96xf32> to vector<8x32xf32>
    %226 = arith.mulf %222, %225 : vector<8x32xf32>
    %227 = arith.addf %224, %226 : vector<8x32xf32>
    %228 = math.tanh %227 : vector<8x32xf32>
    %cst_58 = arith.constant 1.000000e+00 : f32
    %229 = vector.broadcast %cst_58 : f32 to vector<8x32xf32>
    %230 = arith.subf %229, %223 : vector<8x32xf32>
    %231 = arith.mulf %230, %228 : vector<8x32xf32>
    %232 = arith.mulf %223, %205 : vector<8x32xf32>
    %233 = arith.addf %231, %232 : vector<8x32xf32>
    %234 = vector.extract_strided_slice %233 {offsets = [0, 0], sizes = [8, 16], strides = [1, 1]} : vector<8x32xf32> to vector<8x16xf32>
    %c56_59 = arith.constant 56 : index
    %c0_60 = arith.constant 0 : index
    %235 = vector.load %arg3[%c56_59, %c0_60] : memref<64x32xf32, #tpu.memory_space<vmem>>, vector<8x16xf32>
    tpu.vector_store %arg3[%c56_59, %c0_60], %234 {strides = array<i32>} : memref<64x32xf32, #tpu.memory_space<vmem>>, vector<8x16xf32>,
    %236 = vector.extract_strided_slice %233 {offsets = [0, 16], sizes = [8, 16], strides = [1, 1]} : vector<8x32xf32> to vector<8x16xf32>
    %c0_61 = arith.constant 0 : index
    %c16_62 = arith.constant 16 : index
    %237 = vector.load %arg3[%c0_61, %c16_62] : memref<64x32xf32, #tpu.memory_space<vmem>>, vector<8x16xf32>
    tpu.vector_store %arg3[%c0_61, %c16_62], %236 {strides = array<i32>} : memref<64x32xf32, #tpu.memory_space<vmem>>, vector<8x16xf32>,
    %c0_63 = arith.constant 0 : index
    %c0_64 = arith.constant 0 : index
    %238 = vector.load %arg3[%c0_63, %c0_64] : memref<64x32xf32, #tpu.memory_space<vmem>>, vector<64x32xf32>
    %cst_65 = arith.constant dense<0.000000e+00> : vector<64x1xf32>
    %239 = tpu.matmul %238, %7, %cst_65 {dimension_numbers = #tpu.dot_dimension_numbers<[1], [0], [0], [1], [0, 0, 1, 1], [], []>} : vector<64x32xf32>, vector<32x1xf32>, vector<64x1xf32> -> vector<64x1xf32>
    %240 = vector.broadcast %4 : vector<1x1xf32> to vector<64x1xf32>
    %241 = arith.addf %239, %240 : vector<64x1xf32>
    %242 = math.tanh %241 : vector<64x1xf32>
    %243 = vector.broadcast %5 : vector<1x1xf32> to vector<64x1xf32>
    %244 = arith.mulf %242, %243 : vector<64x1xf32>
    %245 = vector.extract_strided_slice %244 {offsets = [0, 0], sizes = [8, 1], strides = [1, 1]} : vector<64x1xf32> to vector<8x1xf32>
    %246 = vector.extract_strided_slice %244 {offsets = [8, 0], sizes = [8, 1], strides = [1, 1]} : vector<64x1xf32> to vector<8x1xf32>
    %247 = vector.extract_strided_slice %244 {offsets = [16, 0], sizes = [8, 1], strides = [1, 1]} : vector<64x1xf32> to vector<8x1xf32>
    %248 = vector.extract_strided_slice %244 {offsets = [24, 0], sizes = [8, 1], strides = [1, 1]} : vector<64x1xf32> to vector<8x1xf32>
    %249 = vector.extract_strided_slice %244 {offsets = [32, 0], sizes = [8, 1], strides = [1, 1]} : vector<64x1xf32> to vector<8x1xf32>
    %250 = vector.extract_strided_slice %244 {offsets = [40, 0], sizes = [8, 1], strides = [1, 1]} : vector<64x1xf32> to vector<8x1xf32>
    %251 = vector.extract_strided_slice %244 {offsets = [48, 0], sizes = [8, 1], strides = [1, 1]} : vector<64x1xf32> to vector<8x1xf32>
    %252 = vector.extract_strided_slice %244 {offsets = [56, 0], sizes = [8, 1], strides = [1, 1]} : vector<64x1xf32> to vector<8x1xf32>
    %253 = arith.maximumf %245, %246 : vector<8x1xf32>
    %254 = arith.maximumf %253, %247 : vector<8x1xf32>
    %255 = arith.maximumf %254, %248 : vector<8x1xf32>
    %256 = arith.maximumf %255, %249 : vector<8x1xf32>
    %257 = arith.maximumf %256, %250 : vector<8x1xf32>
    %258 = arith.maximumf %257, %251 : vector<8x1xf32>
    %259 = arith.maximumf %258, %252 : vector<8x1xf32>
    %260 = arith.subf %245, %259 : vector<8x1xf32>
    %261 = math.exp %260 : vector<8x1xf32>
    %262 = arith.subf %246, %259 : vector<8x1xf32>
    %263 = math.exp %262 : vector<8x1xf32>
    %264 = arith.subf %247, %259 : vector<8x1xf32>
    %265 = math.exp %264 : vector<8x1xf32>
    %266 = arith.subf %248, %259 : vector<8x1xf32>
    %267 = math.exp %266 : vector<8x1xf32>
    %268 = arith.subf %249, %259 : vector<8x1xf32>
    %269 = math.exp %268 : vector<8x1xf32>
    %270 = arith.subf %250, %259 : vector<8x1xf32>
    %271 = math.exp %270 : vector<8x1xf32>
    %272 = arith.subf %251, %259 : vector<8x1xf32>
    %273 = math.exp %272 : vector<8x1xf32>
    %274 = arith.subf %252, %259 : vector<8x1xf32>
    %275 = math.exp %274 : vector<8x1xf32>
    %276 = arith.addf %261, %263 : vector<8x1xf32>
    %277 = arith.addf %276, %265 : vector<8x1xf32>
    %278 = arith.addf %277, %267 : vector<8x1xf32>
    %279 = arith.addf %278, %269 : vector<8x1xf32>
    %280 = arith.addf %279, %271 : vector<8x1xf32>
    %281 = arith.addf %280, %273 : vector<8x1xf32>
    %282 = arith.addf %281, %275 : vector<8x1xf32>
    %283 = tpu.reciprocal %282 {approx = true} : vector<8x1xf32> -> vector<8x1xf32>
    %284 = arith.mulf %261, %283 : vector<8x1xf32>
    %285 = vector.extract_strided_slice %238 {offsets = [0, 0], sizes = [8, 32], strides = [1, 1]} : vector<64x32xf32> to vector<8x32xf32>
    %286 = vector.broadcast %284 : vector<8x1xf32> to vector<8x32xf32>
    %287 = arith.mulf %286, %285 : vector<8x32xf32>
    %288 = arith.mulf %263, %283 : vector<8x1xf32>
    %289 = vector.extract_strided_slice %238 {offsets = [8, 0], sizes = [8, 32], strides = [1, 1]} : vector<64x32xf32> to vector<8x32xf32>
    %290 = vector.broadcast %288 : vector<8x1xf32> to vector<8x32xf32>
    %291 = arith.mulf %290, %289 : vector<8x32xf32>
    %292 = arith.addf %287, %291 : vector<8x32xf32>
    %293 = arith.mulf %265, %283 : vector<8x1xf32>
    %294 = vector.extract_strided_slice %238 {offsets = [16, 0], sizes = [8, 32], strides = [1, 1]} : vector<64x32xf32> to vector<8x32xf32>
    %295 = vector.broadcast %293 : vector<8x1xf32> to vector<8x32xf32>
    %296 = arith.mulf %295, %294 : vector<8x32xf32>
    %297 = arith.addf %292, %296 : vector<8x32xf32>
    %298 = arith.mulf %267, %283 : vector<8x1xf32>
    %299 = vector.extract_strided_slice %238 {offsets = [24, 0], sizes = [8, 32], strides = [1, 1]} : vector<64x32xf32> to vector<8x32xf32>
    %300 = vector.broadcast %298 : vector<8x1xf32> to vector<8x32xf32>
    %301 = arith.mulf %300, %299 : vector<8x32xf32>
    %302 = arith.addf %297, %301 : vector<8x32xf32>
    %303 = arith.mulf %269, %283 : vector<8x1xf32>
    %304 = vector.extract_strided_slice %238 {offsets = [32, 0], sizes = [8, 32], strides = [1, 1]} : vector<64x32xf32> to vector<8x32xf32>
    %305 = vector.broadcast %303 : vector<8x1xf32> to vector<8x32xf32>
    %306 = arith.mulf %305, %304 : vector<8x32xf32>
    %307 = arith.addf %302, %306 : vector<8x32xf32>
    %308 = arith.mulf %271, %283 : vector<8x1xf32>
    %309 = vector.extract_strided_slice %238 {offsets = [40, 0], sizes = [8, 32], strides = [1, 1]} : vector<64x32xf32> to vector<8x32xf32>
    %310 = vector.broadcast %308 : vector<8x1xf32> to vector<8x32xf32>
    %311 = arith.mulf %310, %309 : vector<8x32xf32>
    %312 = arith.addf %307, %311 : vector<8x32xf32>
    %313 = arith.mulf %273, %283 : vector<8x1xf32>
    %314 = vector.extract_strided_slice %238 {offsets = [48, 0], sizes = [8, 32], strides = [1, 1]} : vector<64x32xf32> to vector<8x32xf32>
    %315 = vector.broadcast %313 : vector<8x1xf32> to vector<8x32xf32>
    %316 = arith.mulf %315, %314 : vector<8x32xf32>
    %317 = arith.addf %312, %316 : vector<8x32xf32>
    %318 = arith.mulf %275, %283 : vector<8x1xf32>
    %319 = vector.extract_strided_slice %238 {offsets = [56, 0], sizes = [8, 32], strides = [1, 1]} : vector<64x32xf32> to vector<8x32xf32>
    %320 = vector.broadcast %318 : vector<8x1xf32> to vector<8x32xf32>
    %321 = arith.mulf %320, %319 : vector<8x32xf32>
    %322 = arith.addf %317, %321 : vector<8x32xf32>
    %cst_66 = arith.constant dense<0.000000e+00> : vector<8x8xf32>
    %323 = tpu.matmul %322, %6, %cst_66 {dimension_numbers = #tpu.dot_dimension_numbers<[1], [0], [0], [1], [0, 0, 1, 1], [], []>} : vector<8x32xf32>, vector<32x8xf32>, vector<8x8xf32> -> vector<8x8xf32>
    %324 = vector.broadcast %8 : vector<1x8xf32> to vector<8x8xf32>
    %325 = arith.addf %323, %324 : vector<8x8xf32>
    %c0_67 = arith.constant 0 : index
    %c0_68 = arith.constant 0 : index
    %326 = vector.load %arg2[%c0_67, %c0_68] : memref<8x8xf32, #tpu.memory_space<vmem>>, vector<8x8xf32>
    tpu.vector_store %arg2[%c0_67, %c0_68], %325 {strides = array<i32>} : memref<8x8xf32, #tpu.memory_space<vmem>>, vector<8x8xf32>,
    return
  }
}

</mosaic_0001>

<bundles_post_ra>
// kernel: _sentence_attention_forward.1
= control target key start
LH: loop header
LB: loop body
LE: loop exit
PB: predicated region body
PF: predicated region fallthrough
CT: control target
= control target key end

     0   :  { %vm39_vm0 = vcmask 261120   ;;  %v1713_v8 = vmov 0.0   ;;  %vm1714_vm1 = vmmov 0   ;;  %s1715_s11 = smov 64   ;;  %s1716_s14 = smov 96   ;;  %vm276_vm2 = vcmask 130048   ;;  %s2041_s1 = inlined_call_operand.vmem [shape: f32[112,96], index: 1, kind: input, shape index: {}]   ;;  %s2042_s0 = inlined_call_operand.vmem [shape: f32[64,32], index: 0, kind: input, shape index: {}]   ;;  %s2043_s2 = inlined_call_operand.vmem [shape: f32[8,8], index: 2, kind: output, shape index: {}]  }
   0x1   :  { %v14_v0 = vld [vmem:[%s2041_s1 + $0x18] sm:$0xff]  ;;  %v13_v1 = vld [vmem:[%s2041_s1 + $0x10] sm:$0xff]  ;;  %v31_v2 = vld [vmem:[%s2042_s0 + $0x20] sm:$0xff]  ;;  %vm278_vm3 = vcmask 261248   ;;  %s1717_s26 = smov 120   ;;  %s1718_s29 = smov 127  }
   0x2   :  { %1614 = vmatprep.subr.mxu1 %v14_v0  ;;  %1475 = vmatprep.subr.mxu0 %v14_v0  ;;  %v12_v3 = vld [vmem:[%s2041_s1 + $0x8] sm:$0xff]  ;;  %v11_v4 = vld [vmem:[%s2041_s1] sm:$0xff]  ;;  %v1757_v6 = vld [vmem:[%s2041_s1 + $0x38] sm:$0xff]  ;;  %vm1364_vm4 = vcmask 64512  }
   0x3   :  { %1618 = vmatpush3.msra.mxu1 %v14_v0  ;;  %1489 = vmatprep.mubr.msk.f32.mxu1 %vm39_vm0, %v31_v2  ;;  %v32_v5 = vld [vmem:[%s2042_s0 + $0x28] sm:$0xff]  ;;  %v33_v7 = vld [vmem:[%s2042_s0 + $0x30] sm:$0xff]  ;;  %v27_v10 = vld [vmem:[%s2042_s0] sm:$0xff] }
   0x4   :  { %1615 = vmatprep.subr.mxu1 %v13_v1  ;;  %1476 = vmatpush3.msra.mxu0 %v14_v0  ;;  %v1767_v9 = vld [vmem:[%s2041_s1 + $0x30] sm:$0xff]  ;;  %v34_v11 = vld [vmem:[%s2042_s0 + $0x38] sm:$0xff]  ;;  %v1781_v12 = vld [vmem:[%s2041_s1 + $0x28] sm:$0xff] }
   0x5   :  { %1619 = vmatpush3.msra.mxu1 %v13_v1  ;;  %1477 = vmatprep.subr.mxu0 %v13_v1  ;;  %v28_v13 = vld [vmem:[%s2042_s0 + $0x8] sm:$0xff]  ;;  %v1793_v14 = vld [vmem:[%s2041_s1 + $0x20] sm:$0xff]  ;;  %v29_v56 = vld [vmem:[%s2042_s0 + $0x10] sm:$0xff] }
   0x6   :  { %1616 = vmatprep.subr.mxu1 %v12_v3  ;;  %1478 = vmatpush3.msra.mxu0 %v13_v1  ;;  %v1833_v19 = vld [vmem:[%s2041_s1 + $0x41] ss:$0 sm:$0xff]  ;;  %v1840_v25 = vld [vmem:[%s2041_s1 + $0x40] ss:$0 sm:$0xff]  ;;  %v30_v57 = vld [vmem:[%s2042_s0 + $0x18] sm:$0xff] }
   0x7   :  { %1620 = vmatpush3.msra.mxu1 %v12_v3  ;;  %1479 = vmatprep.subr.mxu0 %v12_v3 }
   0x8   :  { %1617 = vmatprep.subr.mxu1 %v11_v4  ;;  %1480 = vmatpush3.msra.mxu0 %v12_v3 }
   0x9   :  { %1621 = vmatpush3.msra.mxu1 %v11_v4  ;;  %1481 = vmatprep.subr.mxu0 %v11_v4 }
   0xa   :  { %1490 = vmatmul.mubr.msk.f32.vlgmr.msra.gmra.mxu1 %vm39_vm0, %v32_v5  ;;  %1495 = vmatprep.subr.mxu1 %v1713_v8 }
   0xb   :  { %1496 = vmatpush3.msra.mxu1 %v1757_v6  ;;  %1492 = vmatprep.mubr.msk.f32.mxu1 %vm39_vm0, %v33_v7 }
   0xc   :  { %1497 = vmatprep.subr.mxu1 %v1713_v8  ;;  %1482 = vmatpush3.msra.mxu0 %v11_v4 }
   0xd   :  { %1498 = vmatpush3.msra.mxu1 %v1767_v9  ;;  %1483 = vmatprep.mubr.msk.f32.mxu0 %vm39_vm0, %v27_v10 }
   0xe   :  { %1493 = vmatmul.mubr.msk.f32.gmra.mxu1 %vm39_vm0, %v34_v11  ;;  %1499 = vmatprep.subr.mxu1 %v1713_v8 }
   0xf   :  { %1500 = vmatpush3.msra.mxu1 %v1781_v12  ;;  %1484 = vmatmul.mubr.msk.f32.vlgmr.msra.gmra.mxu0 %vm39_vm0, %v28_v13 }
  0x10   :  { %1501 = vmatprep.subr.mxu1 %v1713_v8  ;;  %1503 = vmatprep.mubr.msk.f32.mxu1 %vm1714_vm1, %v1713_v8 }
  0x11   :  { %1502 = vmatpush3.msra.mxu1 %v1793_v14  ;;  %1517 = vmatprep.subr.mxu0 %v1713_v8 }
  0x12   :  { %1504 = vmatmul.mubr.f32.vlgmr.msra.gmra.mxu1 %v1713_v8  ;;  %1506 = vmatprep.subr.mxu1 %v1713_v8 }
  0x13   :  { %1507 = vmatpush3.msra.mxu1 %v1757_v6  ;;  %1514 = vmatprep.mubr.msk.f32.mxu1 %vm1714_vm1, %v1713_v8 }
  0x14   :  { %1508 = vmatprep.subr.mxu1 %v1713_v8  ;;  %1518 = vmatpush3.msra.mxu0 %v1757_v6 }
  0x15   :  { %1509 = vmatpush3.msra.mxu1 %v1767_v9  ;;  %1519 = vmatprep.subr.mxu0 %v1713_v8 }
  0x16   :  { %1510 = vmatprep.subr.mxu1 %v1713_v8  ;;  %1520 = vmatpush3.msra.mxu0 %v1767_v9 }
  0x17   :  { %1511 = vmatpush3.msra.mxu1 %v1781_v12  ;;  %1521 = vmatprep.subr.mxu0 %v1713_v8 }
  0x18   :  { %1512 = vmatprep.subr.mxu1 %v1713_v8  ;;  %1522 = vmatpush3.msra.mxu0 %v1781_v12 }
  0x19   :  { %1513 = vmatpush3.msra.mxu1 %v1793_v14  ;;  %1523 = vmatprep.subr.mxu0 %v1713_v8 }
  0x1a   :  { %1524 = vmatpush3.msra.mxu0 %v1793_v14  ;;  %1528 = vmatprep.subr.mxu1 %v1713_v8 }
  0x1b   :  { %1539 = vmatprep.subr.mxu0 %v1713_v8  ;;  %1486 = vmatprep.mubr.msk.f32.mxu0 %vm39_vm0, %v29_v56 }
  0x1c   :  { %1487 = vmatmul.mubr.msk.f32.gmra.mxu0 %vm39_vm0, %v30_v57 }
  0x1d   :  { %1525 = vmatprep.mubr.msk.f32.mxu0 %vm1714_vm1, %v1713_v8 }
  0xca   :  { %v1822_v15 = vpop.f32.mrf.mxu1 }
  0xcc   :  { %v1824_v16 = vpop.f32.mrf.mxu1 }
  0xcd   :  { %v151_v57 = vadd.f32 %v1840_v25, %v1824_v16 }
  0xce   :  { %v1826_v17 = vpop.f32.mrf.mxu1 }
  0xcf   :  { %v1485_v23 = vpop.f32.mrf.mxu0 }
  0xd0   :  { %v1828_v18 = vpop.f32.mrf.mxu1  ;;  %v136_v46 = vadd.f32 %v1485_v23, %v1840_v25 }
  0xd1   :  { %v130_v24 = vpop.f32.mrf.mxu0 }
  0xd2   :  { %v242_v20 = vpop.f32.mrf.mxu1  ;;  %v131_v26 = vadd.f32 %v1840_v25, %v130_v24 }
  0xd3   :  { %v243_v21 = vadd.f32 %v1833_v19, %v242_v20 }
  0xd4   :  { %v1505_v22 = vpop.f32.mrf.mxu1 }
  0xd5   :  { %254 = vrot.lane.b32.xlu0 %v243_v21, %s1715_s11  ;;  %v246_v27 = vadd.f32 %v243_v21, %v131_v26 }
  0xd7   :  { %v1380_v28 = vmul.f32 -1.442695, %v246_v27 }
  0xd9   :  { %1631 = vpow2.f32 %v1380_v28 }
  0xdc   :  { %v1488_v1 = vpop.f32.mrf.mxu0 }
  0xde   :  { %v140_v2 = vpop.f32.mrf.mxu0 }
  0xdf   :  { %v141_v7 = vadd.f32 %v1840_v25, %v140_v2 }
  0xe6   :  { %v1632_v29 = vpop.eup %1631 }
  0xe7   :  { %v250_v30 = vadd.f32 1.0, %v1632_v29 }
  0xe9   :  { %1633 = vrcp.f32 %v250_v30 }
  0xf6   :  { %v1634_v31 = vpop.eup %1633 }
  0xf7   :  { %v264_v37 = vsub.f32 1.0, %v1634_v31  ;;  %v270_v39 = vmul.f32 0.0, %v1634_v31 }
 0x147   :  { %v255_v32 = vpop.permute.xlu0 %254 }
 0x148   :  { %v257_v33 = vmul.f32 %v1634_v31, %v255_v32 }
 0x14a   :  { %259 = vrot.lane.b32.xlu0 %v257_v33, %s1715_s11 }
 0x1bc   :  { %v260_v34 = vpop.permute.xlu0 %259 }
 0x1bd   :  { %v262_v35 = vadd.f32 %v260_v34, %v131_v26 }
 0x1bf   :  { %1635 = vtanh.f32 %v262_v35 }
 0x1cc   :  { %v1636_v36 = vpop.eup %1635 }
 0x1cd   :  { %266 = vrot.lane.b32.xlu1 %v1636_v36, %s1716_s14 }
 0x23f   :  { %v267_v38 = vpop.permute.xlu1 %266 }
 0x240   :  { %v269_v40 = vmul.f32 %v267_v38, %v264_v37  ;;  %v146_v37 = vadd.f32 %v1488_v1, %v1840_v25 }
 0x242   :  { %v271_v41 = vadd.f32 %v270_v39, %v269_v40 }
 0x244   :  { %273 = vrot.lane.b32.xlu1 %v271_v41, %s1716_s14 }
 0x2b6   :  { %v274_v42 = vpop.permute.xlu1 %273 }
 0x2b7   :  { %277 = vst.msk [vmem:[#allocation2] sm:$0xff] %vm276_vm2, %v274_v42  ;;  %1515 = vmatmul.mubr.msk.f32.vlgmr.msra.gmra.mxu1 %vm39_vm0, %v274_v42 }
 0x2b8   :  { %279 = vst.msk [vmem:[#allocation2 + $0x38] sm:$0xff] %vm278_vm3, %v274_v42  ;;  %1529 = vmatpush3.msra.mxu1 %v1757_v6  ;;  %1536 = vmatprep.mubr.msk.f32.mxu1 %vm1714_vm1, %v1713_v8 }
 0x2b9   :  { %1530 = vmatprep.subr.mxu1 %v1713_v8 }
 0x2ba   :  { %1531 = vmatpush3.msra.mxu1 %v1767_v9 }
 0x2bb   :  { %1532 = vmatprep.subr.mxu1 %v1713_v8 }
 0x2bc   :  { %1533 = vmatpush3.msra.mxu1 %v1781_v12 }
 0x2bd   :  { %1534 = vmatprep.subr.mxu1 %v1713_v8 }
 0x2be   :  { %1535 = vmatpush3.msra.mxu1 %v1793_v14 }
 0x2bf   :  { %1550 = vmatprep.subr.mxu1 %v1713_v8 }
 0x377   :  { %v348_v43 = vpop.f32.mrf.mxu1 }
 0x378   :  { %v349_v44 = vadd.f32 %v1833_v19, %v348_v43 }
 0x379   :  { %v1516_v45 = vpop.f32.mrf.mxu1 }
 0x37a   :  { %360 = vrot.lane.b32.xlu0 %v349_v44, %s1715_s11  ;;  %v352_v47 = vadd.f32 %v349_v44, %v136_v46 }
 0x37c   :  { %v1382_v48 = vmul.f32 -1.442695, %v352_v47 }
 0x37e   :  { %1637 = vpow2.f32 %v1382_v48 }
 0x38b   :  { %v1638_v49 = vpop.eup %1637 }
 0x38c   :  { %v356_v50 = vadd.f32 1.0, %v1638_v49 }
 0x38e   :  { %1639 = vrcp.f32 %v356_v50 }
 0x39b   :  { %v1640_v51 = vpop.eup %1639 }
 0x39c   :  { %v370_v59 = vsub.f32 1.0, %v1640_v51  ;;  %v376_v61 = vmul.f32 %v1640_v51, %v271_v41 }
 0x3ec   :  { %v361_v52 = vpop.permute.xlu0 %360 }
 0x3ed   :  { %v363_v53 = vmul.f32 %v1640_v51, %v361_v52 }
 0x3ef   :  { %365 = vrot.lane.b32.xlu1 %v363_v53, %s1715_s11 }
 0x461   :  { %v366_v54 = vpop.permute.xlu1 %365 }
 0x462   :  { %v368_v55 = vadd.f32 %v366_v54, %v136_v46 }
 0x464   :  { %1641 = vtanh.f32 %v368_v55 }
 0x471   :  { %v1642_v58 = vpop.eup %1641 }
 0x472   :  { %372 = vrot.lane.b32.xlu0 %v1642_v58, %s1716_s14 }
 0x4e4   :  { %v373_v60 = vpop.permute.xlu0 %372 }
 0x4e5   :  { %v375_v62 = vmul.f32 %v373_v60, %v370_v59 }
 0x4e7   :  { %v377_v63 = vadd.f32 %v376_v61, %v375_v62 }
 0x4e9   :  { %379 = vrot.lane.b32.xlu1 %v377_v63, %s1716_s14 }
 0x55b   :  { %v380_v0 = vpop.permute.xlu1 %379 }
 0x55c   :  { %382 = vst.msk [vmem:[#allocation2 + $0x8] sm:$0xff] %vm276_vm2, %v380_v0  ;;  %1526 = vmatmul.mubr.msk.f32.vlgmr.msra.gmra.mxu0 %vm39_vm0, %v380_v0 }
 0x55d   :  { %383 = vst.msk [vmem:[#allocation2 + $0x30] sm:$0xff] %vm278_vm3, %v380_v0  ;;  %1540 = vmatpush3.msra.mxu0 %v1757_v6  ;;  %1547 = vmatprep.mubr.msk.f32.mxu0 %vm1714_vm1, %v1713_v8 }
 0x55e   :  { %1541 = vmatprep.subr.mxu0 %v1713_v8 }
 0x55f   :  { %1542 = vmatpush3.msra.mxu0 %v1767_v9 }
 0x560   :  { %1543 = vmatprep.subr.mxu0 %v1713_v8 }
 0x561   :  { %1544 = vmatpush3.msra.mxu0 %v1781_v12 }
 0x562   :  { %1545 = vmatprep.subr.mxu0 %v1713_v8 }
 0x563   :  { %1546 = vmatpush3.msra.mxu0 %v1793_v14 }
 0x564   :  { %1561 = vmatprep.subr.mxu0 %v1713_v8 }
 0x61c   :  { %v452_v3 = vpop.f32.mrf.mxu0 }
 0x61d   :  { %v453_v4 = vadd.f32 %v1833_v19, %v452_v3 }
 0x61e   :  { %v1527_v5 = vpop.f32.mrf.mxu0 }
 0x61f   :  { %464 = vrot.lane.b32.xlu0 %v453_v4, %s1715_s11  ;;  %v456_v10 = vadd.f32 %v453_v4, %v141_v7 }
 0x621   :  { %v1384_v11 = vmul.f32 -1.442695, %v456_v10 }
 0x623   :  { %1643 = vpow2.f32 %v1384_v11 }
 0x630   :  { %v1644_v13 = vpop.eup %1643 }
 0x631   :  { %v460_v20 = vadd.f32 1.0, %v1644_v13 }
 0x633   :  { %1645 = vrcp.f32 %v460_v20 }
 0x640   :  { %v1646_v21 = vpop.eup %1645 }
 0x641   :  { %v474_v28 = vsub.f32 1.0, %v1646_v21  ;;  %v480_v30 = vmul.f32 %v1646_v21, %v377_v63 }
 0x691   :  { %v465_v22 = vpop.permute.xlu0 %464 }
 0x692   :  { %v467_v23 = vmul.f32 %v1646_v21, %v465_v22  ;;  %v156_v21 = vadd.f32 %v1822_v15, %v1840_v25 }
 0x694   :  { %469 = vrot.lane.b32.xlu1 %v467_v23, %s1715_s11 }
 0x706   :  { %v470_v24 = vpop.permute.xlu1 %469 }
 0x707   :  { %v472_v26 = vadd.f32 %v470_v24, %v141_v7 }
 0x709   :  { %1647 = vtanh.f32 %v472_v26 }
 0x716   :  { %v1648_v27 = vpop.eup %1647 }
 0x717   :  { %476 = vrot.lane.b32.xlu0 %v1648_v27, %s1716_s14 }
 0x789   :  { %v477_v29 = vpop.permute.xlu0 %476 }
 0x78a   :  { %v479_v31 = vmul.f32 %v477_v29, %v474_v28 }
 0x78c   :  { %v481_v32 = vadd.f32 %v480_v30, %v479_v31 }
 0x78e   :  { %483 = vrot.lane.b32.xlu1 %v481_v32, %s1716_s14 }
 0x800   :  { %v484_v33 = vpop.permute.xlu1 %483 }
 0x801   :  { %486 = vst.msk [vmem:[#allocation2 + $0x10] sm:$0xff] %vm276_vm2, %v484_v33  ;;  %1537 = vmatmul.mubr.msk.f32.vlgmr.msra.gmra.mxu1 %vm39_vm0, %v484_v33 }
 0x802   :  { %487 = vst.msk [vmem:[#allocation2 + $0x28] sm:$0xff] %vm278_vm3, %v484_v33  ;;  %1551 = vmatpush3.msra.mxu1 %v1757_v6  ;;  %1558 = vmatprep.mubr.msk.f32.mxu1 %vm1714_vm1, %v1713_v8 }
 0x803   :  { %1552 = vmatprep.subr.mxu1 %v1713_v8 }
 0x804   :  { %1553 = vmatpush3.msra.mxu1 %v1767_v9 }
 0x805   :  { %1554 = vmatprep.subr.mxu1 %v1713_v8 }
 0x806   :  { %1555 = vmatpush3.msra.mxu1 %v1781_v12 }
 0x807   :  { %1556 = vmatprep.subr.mxu1 %v1713_v8 }
 0x808   :  { %1557 = vmatpush3.msra.mxu1 %v1793_v14 }
 0x809   :  { %1572 = vmatprep.subr.mxu1 %v1713_v8 }
 0x8c1   :  { %v556_v34 = vpop.f32.mrf.mxu1 }
 0x8c2   :  { %v557_v35 = vadd.f32 %v1833_v19, %v556_v34 }
 0x8c3   :  { %v1538_v36 = vpop.f32.mrf.mxu1 }
 0x8c4   :  { %568 = vrot.lane.b32.xlu0 %v557_v35, %s1715_s11  ;;  %v560_v38 = vadd.f32 %v557_v35, %v146_v37 }
 0x8c6   :  { %v1386_v39 = vmul.f32 -1.442695, %v560_v38  ;;  %v161_v38 = vadd.f32 %v1840_v25, %v1828_v18 }
 0x8c8   :  { %1649 = vpow2.f32 %v1386_v39 }
 0x8d5   :  { %v1650_v40 = vpop.eup %1649 }
 0x8d6   :  { %v564_v41 = vadd.f32 1.0, %v1650_v40 }
 0x8d8   :  { %1651 = vrcp.f32 %v564_v41 }
 0x8e5   :  { %v1652_v42 = vpop.eup %1651 }
 0x8e6   :  { %v578_v48 = vsub.f32 1.0, %v1652_v42  ;;  %v584_v50 = vmul.f32 %v1652_v42, %v481_v32 }
 0x936   :  { %v569_v43 = vpop.permute.xlu0 %568 }
 0x937   :  { %v571_v44 = vmul.f32 %v1652_v42, %v569_v43 }
 0x939   :  { %573 = vrot.lane.b32.xlu1 %v571_v44, %s1715_s11 }
 0x9ab   :  { %v574_v45 = vpop.permute.xlu1 %573 }
 0x9ac   :  { %v576_v46 = vadd.f32 %v574_v45, %v146_v37 }
 0x9ae   :  { %1653 = vtanh.f32 %v576_v46 }
 0x9bb   :  { %v1654_v47 = vpop.eup %1653 }
 0x9bc   :  { %580 = vrot.lane.b32.xlu0 %v1654_v47, %s1716_s14 }
 0xa2e   :  { %v581_v49 = vpop.permute.xlu0 %580 }
 0xa2f   :  { %v583_v51 = vmul.f32 %v581_v49, %v578_v48 }
 0xa31   :  { %v585_v52 = vadd.f32 %v584_v50, %v583_v51 }
 0xa33   :  { %587 = vrot.lane.b32.xlu1 %v585_v52, %s1716_s14 }
 0xaa5   :  { %v588_v53 = vpop.permute.xlu1 %587 }
 0xaa6   :  { %590 = vst.msk [vmem:[#allocation2 + $0x18] sm:$0xff] %vm276_vm2, %v588_v53  ;;  %1548 = vmatmul.mubr.msk.f32.vlgmr.msra.gmra.mxu0 %vm39_vm0, %v588_v53 }
 0xaa7   :  { %591 = vst.msk [vmem:[#allocation2 + $0x20] sm:$0xff] %vm278_vm3, %v588_v53  ;;  %1562 = vmatpush3.msra.mxu0 %v1757_v6  ;;  %1569 = vmatprep.mubr.msk.f32.mxu0 %vm1714_vm1, %v1713_v8 }
 0xaa8   :  { %1563 = vmatprep.subr.mxu0 %v1713_v8 }
 0xaa9   :  { %1564 = vmatpush3.msra.mxu0 %v1767_v9 }
 0xaaa   :  { %1565 = vmatprep.subr.mxu0 %v1713_v8 }
 0xaab   :  { %1566 = vmatpush3.msra.mxu0 %v1781_v12 }
 0xaac   :  { %1567 = vmatprep.subr.mxu0 %v1713_v8 }
 0xaad   :  { %1568 = vmatpush3.msra.mxu0 %v1793_v14 }
 0xb66   :  { %v660_v54 = vpop.f32.mrf.mxu0 }
 0xb67   :  { %v661_v55 = vadd.f32 %v1833_v19, %v660_v54 }
 0xb68   :  { %v1549_v56 = vpop.f32.mrf.mxu0 }
 0xb69   :  { %672 = vrot.lane.b32.xlu0 %v661_v55, %s1715_s11  ;;  %v664_v58 = vadd.f32 %v661_v55, %v151_v57 }
 0xb6b   :  { %v1388_v59 = vmul.f32 -1.442695, %v664_v58 }
 0xb6d   :  { %1655 = vpow2.f32 %v1388_v59 }
 0xb7a   :  { %v1656_v60 = vpop.eup %1655 }
 0xb7b   :  { %v668_v61 = vadd.f32 1.0, %v1656_v60 }
 0xb7d   :  { %1657 = vrcp.f32 %v668_v61 }
 0xb8a   :  { %v1658_v62 = vpop.eup %1657 }
 0xb8b   :  { %v682_v4 = vsub.f32 1.0, %v1658_v62  ;;  %v688_v16 = vmul.f32 %v1658_v62, %v585_v52 }
 0xbdb   :  { %v673_v63 = vpop.permute.xlu0 %672 }
 0xbdc   :  { %v675_v0 = vmul.f32 %v1658_v62, %v673_v63 }
 0xbde   :  { %677 = vrot.lane.b32.xlu1 %v675_v0, %s1715_s11 }
 0xc50   :  { %v678_v1 = vpop.permute.xlu1 %677 }
 0xc51   :  { %v680_v2 = vadd.f32 %v678_v1, %v151_v57  ;;  %v166_v57 = vadd.f32 %v1826_v17, %v1840_v25  ;;  %v24_v17 = vld [vmem:[%s2041_s1 + $0x58] sm:$0xff]  ;;  %v23_v25 = vld [vmem:[%s2041_s1 + $0x50] sm:$0xff] }
 0xc53   :  { %1659 = vtanh.f32 %v680_v2 }
 0xc60   :  { %v1660_v3 = vpop.eup %1659 }
 0xc61   :  { %684 = vrot.lane.b32.xlu0 %v1660_v3, %s1716_s14  ;;  %v22_v3 = vld [vmem:[%s2041_s1 + $0x48] sm:$0xff] }
 0xcd3   :  { %v685_v5 = vpop.permute.xlu0 %684 }
 0xcd4   :  { %v687_v7 = vmul.f32 %v685_v5, %v682_v4 }
 0xcd6   :  { %v689_v10 = vadd.f32 %v688_v16, %v687_v7 }
 0xcd8   :  { %691 = vrot.lane.b32.xlu1 %v689_v10, %s1716_s14 }
 0xd4a   :  { %v692_v11 = vpop.permute.xlu1 %691 }
 0xd4b   :  { %694 = vst.msk [vmem:[#allocation2 + $0x20] sm:$0xff] %vm276_vm2, %v692_v11  ;;  %1559 = vmatmul.mubr.msk.f32.vlgmr.msra.gmra.mxu1 %vm39_vm0, %v692_v11 }
 0xd4c   :  { %695 = vst.msk [vmem:[#allocation2 + $0x18] sm:$0xff] %vm278_vm3, %v692_v11  ;;  %1573 = vmatpush3.msra.mxu1 %v1757_v6  ;;  %1580 = vmatprep.mubr.msk.f32.mxu1 %vm1714_vm1, %v1713_v8 }
 0xd4d   :  { %1574 = vmatprep.subr.mxu1 %v1713_v8 }
 0xd4e   :  { %1575 = vmatpush3.msra.mxu1 %v1767_v9 }
 0xd4f   :  { %1576 = vmatprep.subr.mxu1 %v1713_v8 }
 0xd50   :  { %1577 = vmatpush3.msra.mxu1 %v1781_v12 }
 0xd51   :  { %1578 = vmatprep.subr.mxu1 %v1713_v8 }
 0xd52   :  { %1579 = vmatpush3.msra.mxu1 %v1793_v14 }
 0xd53   :  { %1603 = vmatprep.subr.mxu1 %v1713_v8 }
 0xe0b   :  { %v764_v13 = vpop.f32.mrf.mxu1 }
 0xe0c   :  { %v765_v6 = vadd.f32 %v1833_v19, %v764_v13 }
 0xe0d   :  { %v1560_v20 = vpop.f32.mrf.mxu1 }
 0xe0e   :  { %776 = vrot.lane.b32.xlu0 %v765_v6, %s1715_s11  ;;  %v768_v9 = vadd.f32 %v765_v6, %v156_v21 }
 0xe10   :  { %v1390_v22 = vmul.f32 -1.442695, %v768_v9 }
 0xe12   :  { %1661 = vpow2.f32 %v1390_v22 }
 0xe1f   :  { %v1662_v23 = vpop.eup %1661 }
 0xe20   :  { %v772_v12 = vadd.f32 1.0, %v1662_v23 }
 0xe22   :  { %1663 = vrcp.f32 %v772_v12 }
 0xe2f   :  { %v1664_v24 = vpop.eup %1663 }
 0xe30   :  { %v786_v30 = vsub.f32 1.0, %v1664_v24  ;;  %v792_v15 = vmul.f32 %v1664_v24, %v689_v10 }
 0xe80   :  { %v777_v26 = vpop.permute.xlu0 %776 }
 0xe81   :  { %v779_v14 = vmul.f32 %v1664_v24, %v777_v26  ;;  %v2006_v24 = vld [vmem:[#allocation2 + $0x18] sm:$0xff]  ;;  %v2010_v26 = vld [vmem:[#allocation2 + $0x20] sm:$0xff] }
 0xe83   :  { %781 = vrot.lane.b32.xlu1 %v779_v14, %s1715_s11 }
 0xef5   :  { %v782_v27 = vpop.permute.xlu1 %781 }
 0xef6   :  { %v784_v28 = vadd.f32 %v782_v27, %v156_v21 }
 0xef8   :  { %1665 = vtanh.f32 %v784_v28 }
 0xf05   :  { %v1666_v29 = vpop.eup %1665 }
 0xf06   :  { %788 = vrot.lane.b32.xlu0 %v1666_v29, %s1716_s14  ;;  %v1719_v29 = vmov 0  }
 0xf07   :  { %1630 = vset.pattern.permute.xlu0 %v1719_v29  ;;  %1629 = vset.pattern.permute.xlu1 %v1719_v29 }
 0xf78   :  { %v789_v31 = vpop.permute.xlu0 %788 }
 0xf79   :  { %v791_v32 = vmul.f32 %v789_v31, %v786_v30 }
 0xf7b   :  { %v793_v33 = vadd.f32 %v792_v15, %v791_v32 }
 0xf7d   :  { %795 = vrot.lane.b32.xlu1 %v793_v33, %s1716_s14 }
 0xfef   :  { %v796_v34 = vpop.permute.xlu1 %795 }
 0xff0   :  { %798 = vst.msk [vmem:[#allocation2 + $0x28] sm:$0xff] %vm276_vm2, %v796_v34  ;;  %1570 = vmatmul.mubr.msk.f32.vlgmr.msra.gmra.mxu0 %vm39_vm0, %v796_v34 }
 0xff1   :  { %799 = vst.msk [vmem:[#allocation2 + $0x10] sm:$0xff] %vm278_vm3, %v796_v34 }
 0xff7   :  { %v2014_v14 = vld [vmem:[#allocation2 + $0x28] sm:$0xff] }
 0xff8   :  { %v2002_v12 = vld [vmem:[#allocation2 + $0x10] sm:$0xff] }
0x10b0   :  { %v868_v35 = vpop.f32.mrf.mxu0 }
0x10b1   :  { %v869_v36 = vadd.f32 %v1833_v19, %v868_v35 }
0x10b2   :  { %v1571_v37 = vpop.f32.mrf.mxu0 }
0x10b3   :  { %880 = vrot.lane.b32.xlu0 %v869_v36, %s1715_s11  ;;  %v872_v39 = vadd.f32 %v869_v36, %v161_v38 }
0x10b5   :  { %v1392_v40 = vmul.f32 -1.442695, %v872_v39 }
0x10b7   :  { %1667 = vpow2.f32 %v1392_v40 }
0x10c4   :  { %v1668_v41 = vpop.eup %1667 }
0x10c5   :  { %v876_v42 = vadd.f32 1.0, %v1668_v41 }
0x10c7   :  { %1669 = vrcp.f32 %v876_v42 }
0x10d4   :  { %v1670_v43 = vpop.eup %1669 }
0x10d5   :  { %v890_v49 = vsub.f32 1.0, %v1670_v43  ;;  %v896_v18 = vmul.f32 %v1670_v43, %v793_v33 }
0x1125   :  { %v881_v44 = vpop.permute.xlu0 %880 }
0x1126   :  { %v883_v45 = vmul.f32 %v1670_v43, %v881_v44 }
0x1128   :  { %885 = vrot.lane.b32.xlu1 %v883_v45, %s1715_s11 }
0x119a   :  { %v886_v46 = vpop.permute.xlu1 %885 }
0x119b   :  { %v888_v47 = vadd.f32 %v886_v46, %v161_v38 }
0x119d   :  { %1671 = vtanh.f32 %v888_v47 }
0x11aa   :  { %v1672_v48 = vpop.eup %1671 }
0x11ab   :  { %892 = vrot.lane.b32.xlu0 %v1672_v48, %s1716_s14 }
0x121d   :  { %v893_v50 = vpop.permute.xlu0 %892 }
0x121e   :  { %v895_v51 = vmul.f32 %v893_v50, %v890_v49 }
0x1220   :  { %v897_v52 = vadd.f32 %v896_v18, %v895_v51 }
0x1222   :  { %899 = vrot.lane.b32.xlu1 %v897_v52, %s1716_s14 }
0x1294   :  { %v900_v53 = vpop.permute.xlu1 %899 }
0x1295   :  { %902 = vst.msk [vmem:[#allocation2 + $0x30] sm:$0xff] %vm276_vm2, %v900_v53  ;;  %1581 = vmatmul.mubr.msk.f32.vlgmr.msra.gmra.mxu1 %vm39_vm0, %v900_v53 }
0x1296   :  { %903 = vst.msk [vmem:[#allocation2 + $0x8] sm:$0xff] %vm278_vm3, %v900_v53  ;;  %1611 = vmatprep.mubr.msk.f32.mxu1 %vm1714_vm1, %v1713_v8 }
0x129c   :  { %v2018_v27 = vld [vmem:[#allocation2 + $0x30] sm:$0xff] }
0x129d   :  { %v1998_v23 = vld [vmem:[#allocation2 + $0x8] sm:$0xff] }
0x1355   :  { %v972_v54 = vpop.f32.mrf.mxu1 }
0x1356   :  { %v973_v55 = vadd.f32 %v1833_v19, %v972_v54  ;;  %v25_v19 = vld [vmem:[%s2041_s1 + $0x60] sm:$0xff] }
0x1357   :  { %v1582_v56 = vpop.f32.mrf.mxu1  ;;  %1604 = vmatpush3.msra.mxu1 %v25_v19 }
0x1358   :  { %984 = vrot.lane.b32.xlu0 %v973_v55, %s1715_s11  ;;  %v976_v58 = vadd.f32 %v973_v55, %v166_v57  ;;  %1605 = vmatprep.subr.mxu1 %v1713_v8 }
0x1359   :  { %1606 = vmatpush3.msra.mxu1 %v24_v17 }
0x135a   :  { %v1394_v59 = vmul.f32 -1.442695, %v976_v58  ;;  %1607 = vmatprep.subr.mxu1 %v1713_v8 }
0x135b   :  { %1608 = vmatpush3.msra.mxu1 %v23_v25 }
0x135c   :  { %1673 = vpow2.f32 %v1394_v59  ;;  %1609 = vmatprep.subr.mxu1 %v1713_v8  ;;  %v1395_v8 = vld [vmem:[%s2041_s1 + $0x42] ss:$0 sm:$0xff] }
0x135d   :  { %1610 = vmatpush3.msra.mxu1 %v22_v3 }
0x1369   :  { %v1674_v60 = vpop.eup %1673 }
0x136a   :  { %v980_v61 = vadd.f32 1.0, %v1674_v60 }
0x136c   :  { %1675 = vrcp.f32 %v980_v61 }
0x1379   :  { %v1676_v62 = vpop.eup %1675 }
0x137a   :  { %v994_v5 = vsub.f32 1.0, %v1676_v62  ;;  %v1000_v7 = vmul.f32 %v1676_v62, %v897_v52 }
0x13ca   :  { %v985_v63 = vpop.permute.xlu0 %984 }
0x13cb   :  { %v987_v0 = vmul.f32 %v1676_v62, %v985_v63 }
0x13cd   :  { %989 = vrot.lane.b32.xlu1 %v987_v0, %s1715_s11 }
0x143f   :  { %v990_v1 = vpop.permute.xlu1 %989 }
0x1440   :  { %v992_v2 = vadd.f32 %v990_v1, %v166_v57 }
0x1442   :  { %1677 = vtanh.f32 %v992_v2 }
0x144f   :  { %v1678_v4 = vpop.eup %1677 }
0x1450   :  { %996 = vrot.lane.b32.xlu0 %v1678_v4, %s1716_s14 }
0x1454   :  { %1030 = vrot.lane.b32.xlu0 %v25_v19, %s1717_s26 }
0x1458   :  { %1026 = vrot.lane.b32.xlu0 %v23_v25, %s1717_s26 }
0x145c   :  { %1174 = vrot.lane.b32.xlu0 %v1395_v8, %s1718_s29 }
0x14c2   :  { %v997_v16 = vpop.permute.xlu0 %996 }
0x14c3   :  { %v999_v10 = vmul.f32 %v997_v16, %v994_v5 }
0x14c5   :  { %v1001_v11 = vadd.f32 %v1000_v7, %v999_v10 }
0x14c6   :  { %v1031_v13 = vpop.permute.xlu0 %1030 }
0x14c7   :  { %1003 = vrot.lane.b32.xlu1 %v1001_v11, %s1716_s14  ;;  %1583 = vmatprep.subr.mxu0 %v1031_v13 }
0x14c8   :  { %1584 = vmatpush3.msra.mxu0 %v1031_v13 }
0x14ca   :  { %v1027_v21 = vpop.permute.xlu0 %1026 }
0x14cb   :  { %1028 = vrot.lane.b32.xlu1 %v24_v17, %s1717_s26 }
0x14ce   :  { %v1175_v47 = vpop.permute.xlu0 %1174 }
0x14cf   :  { %1024 = vrot.lane.b32.xlu1 %v22_v3, %s1717_s26 }
0x1539   :  { %v1004_v6 = vpop.permute.xlu1 %1003 }
0x153a   :  { %1006 = vst.msk [vmem:[#allocation2 + $0x38] sm:$0xff] %vm276_vm2, %v1004_v6 }
0x153b   :  { %1007 = vst.msk [vmem:[#allocation2] sm:$0xff] %vm278_vm3, %v1004_v6 }
0x153d   :  { %v1029_v20 = vpop.permute.xlu1 %1028 }
0x153e   :  { %1585 = vmatprep.subr.mxu0 %v1029_v20 }
0x153f   :  { %1586 = vmatpush3.msra.mxu0 %v1029_v20 }
0x1540   :  { %1587 = vmatprep.subr.mxu0 %v1027_v21 }
0x1541   :  { %v1025_v9 = vpop.permute.xlu1 %1024  ;;  %1588 = vmatpush3.msra.mxu0 %v1027_v21  ;;  %v2022_v28 = vld [vmem:[#allocation2 + $0x38] sm:$0xff] }
0x1542   :  { %v1994_v22 = vld [vmem:[#allocation2] sm:$0xff]  ;;  %1589 = vmatprep.subr.mxu0 %v1025_v9 }
0x1543   :  { %1591 = vmatprep.mubr.msk.f32.mxu0 %vm39_vm0, %v1994_v22  ;;  %1590 = vmatpush3.msra.mxu0 %v1025_v9 }
0x1544   :  { %1592 = vmatmul.mubr.msk.f32.vlgmr.msra.gmra.mxu0 %vm39_vm0, %v1998_v23 }
0x1545   :  { %1594 = vmatprep.mubr.msk.f32.mxu0 %vm39_vm0, %v2002_v12 }
0x1548   :  { %1595 = vmatmul.mubr.msk.f32.gmra.mxu0 %vm39_vm0, %v2006_v24 }
0x1549   :  { %1597 = vmatprep.mubr.msk.f32.mxu0 %vm39_vm0, %v2010_v26 }
0x154c   :  { %1598 = vmatmul.mubr.msk.f32.gmra.mxu0 %vm39_vm0, %v2014_v14 }
0x154d   :  { %1600 = vmatprep.mubr.msk.f32.mxu0 %vm39_vm0, %v2018_v27 }
0x1550   :  { %1601 = vmatmul.mubr.msk.f32.gmra.mxu0 %vm39_vm0, %v2022_v28 }
0x1604   :  { %v1593_v30 = vpop.f32.mrf.mxu0 }
0x1605   :  { %v1132_v31 = vadd.f32 %v1593_v30, %v1395_v8 }
0x1606   :  { %v1126_v15 = vpop.f32.mrf.mxu0 }
0x1607   :  { %v1127_v32 = vadd.f32 %v1395_v8, %v1126_v15  ;;  %1679 = vtanh.f32 %v1132_v31 }
0x1608   :  { %v1596_v33 = vpop.f32.mrf.mxu0 }
0x1609   :  { %1681 = vtanh.f32 %v1127_v32  ;;  %v1142_v34 = vadd.f32 %v1596_v33, %v1395_v8 }
0x160a   :  { %v1136_v35 = vpop.f32.mrf.mxu0 }
0x160b   :  { %v1137_v36 = vadd.f32 %v1395_v8, %v1136_v35  ;;  %1683 = vtanh.f32 %v1142_v34 }
0x160c   :  { %v1599_v37 = vpop.f32.mrf.mxu0 }
0x160d   :  { %1685 = vtanh.f32 %v1137_v36  ;;  %v1152_v38 = vadd.f32 %v1599_v37, %v1395_v8 }
0x160e   :  { %v1146_v39 = vpop.f32.mrf.mxu0 }
0x160f   :  { %v1147_v40 = vadd.f32 %v1395_v8, %v1146_v39  ;;  %1687 = vtanh.f32 %v1152_v38 }
0x1610   :  { %v1602_v41 = vpop.f32.mrf.mxu0 }
0x1611   :  { %1689 = vtanh.f32 %v1147_v40  ;;  %v1162_v42 = vadd.f32 %v1602_v41, %v1395_v8 }
0x1612   :  { %v1156_v43 = vpop.f32.mrf.mxu0 }
0x1613   :  { %v1157_v44 = vadd.f32 %v1395_v8, %v1156_v43  ;;  %1691 = vtanh.f32 %v1162_v42 }
0x1614   :  { %v1680_v45 = vpop.eup %1679 }
0x1615   :  { %1693 = vtanh.f32 %v1157_v44  ;;  %v1178_v50 = vmul.f32 %v1680_v45, %v1175_v47 }
0x1616   :  { %v1682_v46 = vpop.eup %1681 }
0x1617   :  { %v1177_v48 = vmul.f32 %v1682_v46, %v1175_v47 }
0x1618   :  { %v1684_v49 = vpop.eup %1683 }
0x1619   :  { %v1185_v52 = vmax.f32 %v1177_v48, %v1178_v50  ;;  %v1180_v54 = vmul.f32 %v1684_v49, %v1175_v47 }
0x161a   :  { %v1686_v18 = vpop.eup %1685 }
0x161b   :  { %v1179_v51 = vmul.f32 %v1686_v18, %v1175_v47 }
0x161c   :  { %v1688_v53 = vpop.eup %1687 }
0x161d   :  { %v1186_v55 = vmax.f32 %v1185_v52, %v1179_v51  ;;  %v1182_v60 = vmul.f32 %v1688_v53, %v1175_v47 }
0x161e   :  { %v1690_v56 = vpop.eup %1689 }
0x161f   :  { %v1181_v57 = vmul.f32 %v1690_v56, %v1175_v47  ;;  %v1187_v58 = vmax.f32 %v1186_v55, %v1180_v54 }
0x1620   :  { %v1692_v59 = vpop.eup %1691 }
0x1621   :  { %v1188_v61 = vmax.f32 %v1187_v58, %v1181_v57  ;;  %v1184_v1 = vmul.f32 %v1692_v59, %v1175_v47 }
0x1622   :  { %v1694_v62 = vpop.eup %1693 }
0x1623   :  { %v1183_v63 = vmul.f32 %v1694_v62, %v1175_v47  ;;  %v1189_v0 = vmax.f32 %v1188_v61, %v1182_v60 }
0x1625   :  { %v1190_v2 = vmax.f32 %v1189_v0, %v1183_v63 }
0x1627   :  { %v1191_v19 = vmax.f32 %v1190_v2, %v1184_v1 }
0x1629   :  { %v1192_v17 = vsub.f32 %v1177_v48, %v1191_v19  ;;  %v1195_v25 = vsub.f32 %v1178_v50, %v1191_v19  ;;  %v1198_v4 = vsub.f32 %v1179_v51, %v1191_v19  ;;  %v1201_v5 = vsub.f32 %v1180_v54, %v1191_v19 }
0x162a   :  { %v1204_v10 = vsub.f32 %v1181_v57, %v1191_v19  ;;  %v1207_v13 = vsub.f32 %v1182_v60, %v1191_v19  ;;  %v1210_v6 = vsub.f32 %v1183_v63, %v1191_v19  ;;  %v1213_v21 = vsub.f32 %v1184_v1, %v1191_v19 }
0x162b   :  { %v1193_v3 = vmul.f32 1.442695, %v1192_v17  ;;  %v1196_v16 = vmul.f32 1.442695, %v1195_v25  ;;  %v1199_v7 = vmul.f32 1.442695, %v1198_v4 }
0x162c   :  { %v1202_v11 = vmul.f32 1.442695, %v1201_v5  ;;  %v1205_v8 = vmul.f32 1.442695, %v1204_v10  ;;  %v1208_v20 = vmul.f32 1.442695, %v1207_v13 }
0x162d   :  { %1695 = vpow2.f32 %v1193_v3  ;;  %v1211_v9 = vmul.f32 1.442695, %v1210_v6  ;;  %v1214_v29 = vmul.f32 1.442695, %v1213_v21 }
0x162e   :  { %1697 = vpow2.f32 %v1196_v16 }
0x162f   :  { %1699 = vpow2.f32 %v1199_v7 }
0x1630   :  { %1701 = vpow2.f32 %v1202_v11 }
0x1631   :  { %1703 = vpow2.f32 %v1205_v8 }
0x1632   :  { %1705 = vpow2.f32 %v1208_v20 }
0x1633   :  { %1707 = vpow2.f32 %v1211_v9 }
0x1634   :  { %1709 = vpow2.f32 %v1214_v29 }
0x163a   :  { %v1696_v30 = vpop.eup %1695 }
0x163b   :  { %v1698_v31 = vpop.eup %1697 }
0x163c   :  { %v1216_v15 = vadd.f32 %v1698_v31, %v1696_v30  ;;  %v1700_v32 = vpop.eup %1699 }
0x163d   :  { %v1702_v34 = vpop.eup %1701 }
0x163e   :  { %v1217_v33 = vadd.f32 %v1700_v32, %v1216_v15  ;;  %v1704_v36 = vpop.eup %1703 }
0x163f   :  { %v1706_v38 = vpop.eup %1705 }
0x1640   :  { %v1218_v35 = vadd.f32 %v1702_v34, %v1217_v33  ;;  %v1708_v40 = vpop.eup %1707 }
0x1641   :  { %v1710_v42 = vpop.eup %1709 }
0x1642   :  { %v1219_v37 = vadd.f32 %v1704_v36, %v1218_v35 }
0x1644   :  { %v1220_v39 = vadd.f32 %v1706_v38, %v1219_v37 }
0x1646   :  { %v1221_v41 = vadd.f32 %v1708_v40, %v1220_v39 }
0x1648   :  { %v1222_v43 = vadd.f32 %v1710_v42, %v1221_v41 }
0x164a   :  { %1711 = vrcp.f32 %v1222_v43 }
0x1657   :  { %v1712_v44 = vpop.eup %1711 }
0x1658   :  { %v1231_v45 = vmul.f32 %v1712_v44, %v1698_v31  ;;  %v1224_v46 = vmul.f32 %v1712_v44, %v1696_v30  ;;  %v1255_v47 = vmul.f32 %v1712_v44, %v1704_v36  ;;  %v1239_v48 = vmul.f32 %v1712_v44, %v1700_v32 }
0x1659   :  { %v1271_v49 = vmul.f32 %v1712_v44, %v1708_v40  ;;  %v1247_v50 = vmul.f32 %v1712_v44, %v1702_v34  ;;  %v1263_v18 = vmul.f32 %v1712_v44, %v1706_v38  ;;  %v1279_v51 = vmul.f32 %v1712_v44, %v1710_v42 }
0x165a   :  { %1234 = vperm.xlu0 %1630, %v1231_v45   ;;  %1227 = vperm.xlu1 %1629, %v1224_v46  }
0x165e   :  { %1258 = vperm.xlu0 %1630, %v1255_v47   ;;  %1242 = vperm.xlu1 %1629, %v1239_v48  }
0x1662   :  { %1274 = vperm.xlu0 %1630, %v1271_v49   ;;  %1250 = vperm.xlu1 %1629, %v1247_v50  }
0x1666   :  { %1266 = vperm.xlu1 %1629, %v1263_v18  }
0x166a   :  { %1282 = vperm.xlu1 %1629, %v1279_v51  }
0x16d5   :  { %v1235_v52 = vpop.permute.xlu0 %1234  ;;  %v1228_v53 = vpop.permute.xlu1 %1227 }
0x16d6   :  { %v1237_v54 = vmul.f32 %v1235_v52, %v1998_v23  ;;  %v1230_v55 = vmul.f32 %v1228_v53, %v1994_v22 }
0x16d8   :  { %v1238_v59 = vadd.f32 %v1237_v54, %v1230_v55 }
0x16d9   :  { %v1243_v56 = vpop.permute.xlu1 %1242  ;;  %v1259_v58 = vpop.permute.xlu0 %1258 }
0x16da   :  { %v1245_v57 = vmul.f32 %v1243_v56, %v2002_v12  ;;  %v1261_v63 = vmul.f32 %v1259_v58, %v2010_v26 }
0x16dc   :  { %v1246_v61 = vadd.f32 %v1245_v57, %v1238_v59 }
0x16dd   :  { %v1251_v60 = vpop.permute.xlu1 %1250  ;;  %v1275_v1 = vpop.permute.xlu0 %1274 }
0x16de   :  { %v1253_v62 = vmul.f32 %v1251_v60, %v2006_v24  ;;  %v1277_v23 = vmul.f32 %v1275_v1, %v2018_v27  ;;  %v1404_v24 = vld [vmem:[%s2041_s1 + $0x68] ss:$0 sm:$0xff] }
0x16e0   :  { %v1254_v0 = vadd.f32 %v1253_v62, %v1246_v61 }
0x16e1   :  { %v1267_v2 = vpop.permute.xlu1 %1266 }
0x16e2   :  { %v1262_v19 = vadd.f32 %v1261_v63, %v1254_v0  ;;  %v1269_v17 = vmul.f32 %v1267_v2, %v2014_v14 }
0x16e4   :  { %v1270_v22 = vadd.f32 %v1269_v17, %v1262_v19 }
0x16e5   :  { %v1283_v25 = vpop.permute.xlu1 %1282 }
0x16e6   :  { %v1278_v3 = vadd.f32 %v1277_v23, %v1270_v22  ;;  %v1285_v12 = vmul.f32 %v1283_v25, %v2022_v28 }
0x16e8   :  { %v1286_v4 = vadd.f32 %v1285_v12, %v1278_v3 }
0x16ea   :  { %1612 = vmatmul.mubr.msk.f32.vlgmr.msra.gmra.mxu1 %vm39_vm0, %v1286_v4 }
0x17aa   :  { %v1360_v26 = vpop.f32.mrf.mxu1 }
0x17ab   :  { %v1361_v5 = vadd.f32 %v1404_v24, %v1360_v26 }
0x17ac   :  { %v1613_v16 = vpop.f32.mrf.mxu1 }
0x17ad   :  { %1365 = vst.msk [vmem:[%s2043_s2] sm:$0xff] %vm1364_vm4, %v1361_v5 }

</bundles_post_ra>
